<compile_context>
chip_gen: v7x
topology: tpu7x:2x2x1
jax: 0.10.0
libtpu: 0.0.40
codegen_flags: <defaults>
</compile_context>

<pallas_src>
import functools

import jax
import jax.numpy as jnp
import numpy as np
from jax import lax
from jax.experimental import pallas as pl
from jax.experimental.pallas import tpu as pltpu


# ----------------------------------------------------------------------------
# Pallas kernel: single invocation, fully unrolled loop over DSPN iterations.
# State = fused [set ; mask] matrix x of shape (B*N, C+1), carried as a value.
# ----------------------------------------------------------------------------
def _dspn_kernel(iters, lr,
                 target_ref, x0_ref, w1t_ref, w1_ref, b1_ref,
                 w2t_ref, w2_ref, b2_ref, pool_ref, poolt_ref,
                 xs_ref, loss_ref, gnorm_ref):
    t = target_ref[...]            # (B, R)
    x = x0_ref[...]                # (B*N, C+1)  fused [set ; mask]
    w1t = w1t_ref[...]             # (C+1, D)    W1^T (full, incl. mask column)
    w1 = w1_ref[...]               # (D, C+1)    W1 (full)
    b1 = b1_ref[...]               # (1, D)
    w2t = w2t_ref[...]             # (D, R)      W2^T
    w2 = w2_ref[...]               # (R, D)      W2
    b2 = b2_ref[...]               # (1, R)
    pool = pool_ref[...]           # (B, B*N)    block-diagonal, entries 1/N
    poolt = poolt_ref[...]         # (B*N, B)    pool^T

    B, R = t.shape
    BN, C1 = x.shape
    inv_br = 1.0 / (B * R)

    # Lane mask selecting the fused mask channel (last column of x).
    col_is_mask = lax.broadcasted_iota(jnp.int32, (BN, C1), 1) == (C1 - 1)

    # Fully unrolled inner loop (iters is small & static for DSPN).
    for it in range(iters):
        # ---- encoder forward: per-element MLP on [set ; mask], mean pool ----
        h_pre = jnp.dot(x, w1t, preferred_element_type=jnp.float32) + b1   # (BN, D)
        relu_mask = (h_pre > 0.0).astype(jnp.float32)
        h = h_pre * relu_mask
        y = jnp.dot(h, w2t, preferred_element_type=jnp.float32) + b2       # (BN, R)
        pred = jnp.dot(pool, y, preferred_element_type=jnp.float32)        # (B, R)

        # ---- smooth L1 loss (beta=1, reduction='mean') ----
        d = pred - t
        ad = jnp.abs(d)
        loss = jnp.mean(jnp.where(ad < 1.0, 0.5 * d * d, ad - 0.5))

        # ---- analytic backward wrt fused state x ----
        g_pred = jnp.clip(d, -1.0, 1.0) * inv_br                           # (B, R)
        g_y = jnp.dot(poolt, g_pred, preferred_element_type=jnp.float32)   # (BN, R)
        g_h = jnp.dot(g_y, w2, preferred_element_type=jnp.float32)         # (BN, D)
        g_hpre = g_h * relu_mask
        g_x = jnp.dot(g_hpre, w1, preferred_element_type=jnp.float32)      # (BN, C+1)

        # grad norm over the set part only (exclude the mask column)
        set_g = jnp.where(col_is_mask, 0.0, g_x)
        gnorm = jnp.sqrt(jnp.sum(set_g * set_g))

        # ---- inner gradient-descent update; clamp only the mask column ----
        x_new = x - lr * g_x
        x_new = jnp.where(col_is_mask, jnp.clip(x_new, 0.0, 1.0), x_new)

        xs_ref[it] = x_new
        loss_ref[it] = loss
        gnorm_ref[it] = gnorm
        x = x_new


# ----------------------------------------------------------------------------
# Wrapper: parameter plumbing / layout unpacking in plain JAX, hot loop in the
# single Pallas kernel invocation.
# ----------------------------------------------------------------------------
def dspn_forward(target_repr, params, *, iters, lr):
    B, R = target_repr.shape
    starting_set = params["starting_set"]     # (1, C, N)
    starting_mask = params["starting_mask"]   # (1, N)
    _, C, N = starting_set.shape
    w1 = params["w1"]                         # (D, C+1)  (last column acts on mask)
    b1 = params["b1"]                         # (D,)
    w2 = params["w2"]                         # (R, D)
    b2 = params["b2"]                         # (R,)
    D = b1.shape[0]
    BN = B * N

    # default-generator branch of the module
    set0_bcn = jnp.broadcast_to(starting_set, (B, C, N))                  # PyTorch layout
    mask0 = jnp.clip(jnp.broadcast_to(starting_mask, (B, N)), 0.0, 1.0)

    # fused [set ; mask] state, rows ordered (b, n), channels last
    set0_rows = jnp.transpose(set0_bcn, (0, 2, 1)).reshape(BN, C)
    x0 = jnp.concatenate([set0_rows, mask0.reshape(BN, 1)], axis=1)       # (BN, C+1)

    # block-diagonal mean-pool matrix (entries 1/N) and its adjoint
    pool = (jnp.eye(B, dtype=jnp.float32)[:, :, None]
            * jnp.full((N,), 1.0 / N, dtype=jnp.float32)).reshape(B, BN)
    poolt = jnp.transpose(pool)

    b1_2d = b1[None, :]
    b2_2d = b2[None, :]

    kernel = functools.partial(_dspn_kernel, int(iters), float(lr))

    vmem_spec = pl.BlockSpec(memory_space=pltpu.MemorySpace.VMEM)
    smem_spec = pl.BlockSpec(memory_space=pltpu.MemorySpace.SMEM)

    xs_o, losses_o, gnorms_o = pl.pallas_call(
        kernel,
        out_shape=(
            jax.ShapeDtypeStruct((iters, BN, C + 1), jnp.float32),
            jax.ShapeDtypeStruct((iters,), jnp.float32),
            jax.ShapeDtypeStruct((iters,), jnp.float32),
        ),
        in_specs=[vmem_spec] * 10,
        out_specs=(vmem_spec, smem_spec, smem_spec),
        compiler_params=pltpu.CompilerParams(
            vmem_limit_bytes=32 * 1024 * 1024),
    )(target_repr, x0,
      jnp.transpose(w1), w1, b1_2d,
      jnp.transpose(w2), w2, b2_2d,
      pool, poolt)

    # layout unpacking back to the module-facing PyTorch layout (B, C, N)
    sets_o = jnp.transpose(xs_o[:, :, :C].reshape(iters, B, N, C), (0, 1, 3, 2))
    masks_o = xs_o[:, :, C].reshape(iters, B, N)

    intermediate_sets = [set0_bcn] + [sets_o[k] for k in range(iters)]
    intermediate_masks = [mask0] + [masks_o[k] for k in range(iters)]
    repr_losses = [losses_o[k] for k in range(iters)]
    grad_norms = [gnorms_o[k] for k in range(iters)]
    return intermediate_sets, intermediate_masks, repr_losses, grad_norms


# ----------------------------------------------------------------------------
# Pure-JAX reference (uses jax.grad) for correctness checking.
# ----------------------------------------------------------------------------
def _encoder_ref(s_bcn, mask, w1, b1, w2, b2):
    x = jnp.concatenate([s_bcn, mask[:, None, :]], axis=1)               # (B, C+1, N)
    h = jax.nn.relu(jnp.einsum('dc,bcn->bdn', w1, x,
                               precision='highest') + b1[None, :, None])
    y = jnp.einsum('rd,bdn->brn', w2, h,
                   precision='highest') + b2[None, :, None]
    y = y / y.shape[2]
    return jnp.sum(y, axis=2)


def _smooth_l1(pred, target):
    d = pred - target
    ad = jnp.abs(d)
    return jnp.mean(jnp.where(ad < 1.0, 0.5 * d * d, ad - 0.5))


def dspn_forward_ref(target_repr, params, *, iters, lr):
    B, R = target_repr.shape
    starting_set = params["starting_set"]
    starting_mask = params["starting_mask"]
    _, C, N = starting_set.shape
    w1, b1, w2, b2 = params["w1"], params["b1"], params["w2"], params["b2"]

    cur_set = jnp.broadcast_to(starting_set, (B, C, N))
    cur_mask = jnp.clip(jnp.broadcast_to(starting_mask, (B, N)), 0.0, 1.0)
    sets, masks, losses, gnorms = [cur_set], [cur_mask], [], []

    def loss_fn(s, m):
        return _smooth_l1(_encoder_ref(s, m, w1, b1, w2, b2), target_repr)

    for _ in range(iters):
        loss, (gs, gm) = jax.value_and_grad(loss_fn, argnums=(0, 1))(cur_set, cur_mask)
        cur_set = cur_set - lr * gs
        cur_mask = jnp.clip(cur_mask - lr * gm, 0.0, 1.0)
        sets.append(cur_set)
        masks.append(cur_mask)
        losses.append(loss)
        gnorms.append(jnp.sqrt(jnp.sum(gs * gs)))
    return sets, masks, losses, gnorms


if __name__ == "__main__":
    # Small shapes: batch=2, repr_channels=32, set_channels=4,
    # max_set_size=16, encoder hidden=32, iters=4, lr=0.1
    B, R, C, N, D = 2, 32, 4, 16, 32
    iters, lr = 4, 0.1

    key = jax.random.PRNGKey(0)
    k_ss, k_t, k_w1, k_w2, k_b1, k_b2 = jax.random.split(key, 6)

    params = {
        "starting_set": jax.random.uniform(k_ss, (1, C, N), jnp.float32),
        "starting_mask": 0.5 * jnp.ones((1, N), jnp.float32),
        "w1": 0.2 * jax.random.normal(k_w1, (D, C + 1), jnp.float32),
        "b1": 0.1 * jax.random.normal(k_b1, (D,), jnp.float32),
        "w2": 0.2 * jax.random.normal(k_w2, (R, D), jnp.float32),
        "b2": 0.1 * jax.random.normal(k_b2, (R,), jnp.float32),
    }
    target_repr = jax.random.normal(k_t, (B, R), jnp.float32)

    sets, masks, losses, gnorms = dspn_forward(target_repr, params, iters=iters, lr=lr)
    jax.block_until_ready(sets[-1])

    # correctness vs pure-JAX autograd reference
    sets_r, masks_r, losses_r, gnorms_r = dspn_forward_ref(
        target_repr, params, iters=iters, lr=lr)
    np.testing.assert_allclose(np.asarray(sets[-1]), np.asarray(sets_r[-1]),
                               rtol=2e-3, atol=2e-3)
    np.testing.assert_allclose(np.asarray(masks[-1]), np.asarray(masks_r[-1]),
                               rtol=2e-3, atol=2e-3)
    np.testing.assert_allclose(np.asarray(jnp.stack(losses)),
                               np.asarray(jnp.stack(losses_r)),
                               rtol=2e-3, atol=2e-3)
    np.testing.assert_allclose(np.asarray(jnp.stack(gnorms)),
                               np.asarray(jnp.stack(gnorms_r)),
                               rtol=2e-3, atol=2e-3)

    print("KERNEL_OK")
</pallas_src>

<mosaic_0001>
module attributes {stable_mosaic.version = 11 : i64} {
  func.func @_dspn_kernel(%arg0: memref<2x32xf32, #tpu.memory_space<vmem>>, %arg1: memref<32x5xf32, #tpu.memory_space<vmem>>, %arg2: memref<5x32xf32, #tpu.memory_space<vmem>>, %arg3: memref<32x5xf32, #tpu.memory_space<vmem>>, %arg4: memref<1x32xf32, #tpu.memory_space<vmem>>, %arg5: memref<32x32xf32, #tpu.memory_space<vmem>>, %arg6: memref<32x32xf32, #tpu.memory_space<vmem>>, %arg7: memref<1x32xf32, #tpu.memory_space<vmem>>, %arg8: memref<2x32xf32, #tpu.memory_space<vmem>>, %arg9: memref<32x2xf32, #tpu.memory_space<vmem>>, %arg10: memref<4x32x5xf32, #tpu.memory_space<vmem>>, %arg11: memref<4xf32, #tpu.memory_space<smem>>, %arg12: memref<4xf32, #tpu.memory_space<smem>>) attributes {dimension_semantics = [], scalar_prefetch = 0 : i64, scratch_operands = 0 : i64, tpu.core_type = #tpu.core_type<tc>} {
    %c0 = arith.constant 0 : index
    %c0_0 = arith.constant 0 : index
    %0 = vector.load %arg0[%c0, %c0_0] : memref<2x32xf32, #tpu.memory_space<vmem>>, vector<2x32xf32>
    %c0_1 = arith.constant 0 : index
    %c0_2 = arith.constant 0 : index
    %1 = vector.load %arg1[%c0_1, %c0_2] : memref<32x5xf32, #tpu.memory_space<vmem>>, vector<32x5xf32>
    %c0_3 = arith.constant 0 : index
    %c0_4 = arith.constant 0 : index
    %2 = vector.load %arg2[%c0_3, %c0_4] : memref<5x32xf32, #tpu.memory_space<vmem>>, vector<5x32xf32>
    %c0_5 = arith.constant 0 : index
    %c0_6 = arith.constant 0 : index
    %3 = vector.load %arg3[%c0_5, %c0_6] : memref<32x5xf32, #tpu.memory_space<vmem>>, vector<32x5xf32>
    %c0_7 = arith.constant 0 : index
    %c0_8 = arith.constant 0 : index
    %4 = vector.load %arg4[%c0_7, %c0_8] : memref<1x32xf32, #tpu.memory_space<vmem>>, vector<1x32xf32>
    %c0_9 = arith.constant 0 : index
    %c0_10 = arith.constant 0 : index
    %5 = vector.load %arg5[%c0_9, %c0_10] : memref<32x32xf32, #tpu.memory_space<vmem>>, vector<32x32xf32>
    %c0_11 = arith.constant 0 : index
    %c0_12 = arith.constant 0 : index
    %6 = vector.load %arg6[%c0_11, %c0_12] : memref<32x32xf32, #tpu.memory_space<vmem>>, vector<32x32xf32>
    %c0_13 = arith.constant 0 : index
    %c0_14 = arith.constant 0 : index
    %7 = vector.load %arg7[%c0_13, %c0_14] : memref<1x32xf32, #tpu.memory_space<vmem>>, vector<1x32xf32>
    %c0_15 = arith.constant 0 : index
    %c0_16 = arith.constant 0 : index
    %8 = vector.load %arg8[%c0_15, %c0_16] : memref<2x32xf32, #tpu.memory_space<vmem>>, vector<2x32xf32>
    %c0_17 = arith.constant 0 : index
    %c0_18 = arith.constant 0 : index
    %9 = vector.load %arg9[%c0_17, %c0_18] : memref<32x2xf32, #tpu.memory_space<vmem>>, vector<32x2xf32>
    %10 = tpu.iota {dimensions = array<i32: 1>} : vector<32x5xi32>
    %c4_i32 = arith.constant 4 : i32
    %11 = vector.broadcast %c4_i32 : i32 to vector<32x5xi32>
    %12 = arith.cmpi eq, %10, %11 : vector<32x5xi32>
    %cst = arith.constant dense<0.000000e+00> : vector<32x32xf32>
    %13 = tpu.matmul %1, %2, %cst {dimension_numbers = #tpu.dot_dimension_numbers<[1], [0], [0], [1], [0, 0, 1, 1], [], []>} : vector<32x5xf32>, vector<5x32xf32>, vector<32x32xf32> -> vector<32x32xf32>
    %14 = vector.broadcast %4 : vector<1x32xf32> to vector<32x32xf32>
    %15 = arith.addf %13, %14 : vector<32x32xf32>
    %cst_19 = arith.constant 0.000000e+00 : f32
    %16 = vector.broadcast %cst_19 : f32 to vector<32x32xf32>
    %17 = arith.cmpf ogt, %15, %16 : vector<32x32xf32>
    %18 = arith.extui %17 : vector<32x32xi1> to vector<32x32xi32>
    %19 = arith.sitofp %18 : vector<32x32xi32> to vector<32x32xf32>
    %20 = arith.mulf %15, %19 : vector<32x32xf32>
    %cst_20 = arith.constant dense<0.000000e+00> : vector<32x32xf32>
    %21 = tpu.matmul %20, %5, %cst_20 {dimension_numbers = #tpu.dot_dimension_numbers<[1], [0], [0], [1], [0, 0, 1, 1], [], []>} : vector<32x32xf32>, vector<32x32xf32>, vector<32x32xf32> -> vector<32x32xf32>
    %22 = vector.broadcast %7 : vector<1x32xf32> to vector<32x32xf32>
    %23 = arith.addf %21, %22 : vector<32x32xf32>
    %cst_21 = arith.constant dense<0.000000e+00> : vector<2x32xf32>
    %24 = tpu.matmul %8, %23, %cst_21 {dimension_numbers = #tpu.dot_dimension_numbers<[1], [0], [0], [1], [0, 0, 1, 1], [], []>} : vector<2x32xf32>, vector<32x32xf32>, vector<2x32xf32> -> vector<2x32xf32>
    %25 = arith.subf %24, %0 : vector<2x32xf32>
    %26 = math.absf %25 : vector<2x32xf32>
    %cst_22 = arith.constant 1.000000e+00 : f32
    %27 = vector.broadcast %cst_22 : f32 to vector<2x32xf32>
    %28 = arith.cmpf olt, %26, %27 : vector<2x32xf32>
    %cst_23 = arith.constant 5.000000e-01 : f32
    %29 = vector.broadcast %cst_23 : f32 to vector<2x32xf32>
    %30 = arith.mulf %29, %25 : vector<2x32xf32>
    %31 = arith.mulf %30, %25 : vector<2x32xf32>
    %cst_24 = arith.constant 5.000000e-01 : f32
    %32 = vector.broadcast %cst_24 : f32 to vector<2x32xf32>
    %33 = arith.subf %26, %32 : vector<2x32xf32>
    %34 = arith.select %28, %31, %33 : vector<2x32xi1>, vector<2x32xf32>
    %35 = vector.shape_cast %34 : vector<2x32xf32> to vector<1x2x32xf32>
    %cst_25 = arith.constant dense<0.000000e+00> : vector<1xf32>
    %36 = vector.multi_reduction <add>, %35, %cst_25 [1, 2] : vector<1x2x32xf32> to vector<1xf32>
    %37 = vector.shape_cast %36 : vector<1xf32> to vector<1x1x1xf32>
    %38 = vector.extract %37[0, 0, 0] : f32 from vector<1x1x1xf32>
    %cst_26 = arith.constant 6.400000e+01 : f32
    %39 = arith.divf %38, %cst_26 : f32
    %cst_27 = arith.constant -1.000000e+00 : f32
    %cst_28 = arith.constant 1.000000e+00 : f32
    %40 = vector.broadcast %cst_27 : f32 to vector<2x32xf32>
    %41 = arith.maximumf %40, %25 : vector<2x32xf32>
    %42 = vector.broadcast %cst_28 : f32 to vector<2x32xf32>
    %43 = arith.minimumf %42, %41 : vector<2x32xf32>
    %cst_29 = arith.constant 1.562500e-02 : f32
    %44 = vector.broadcast %cst_29 : f32 to vector<2x32xf32>
    %45 = arith.mulf %43, %44 : vector<2x32xf32>
    %cst_30 = arith.constant dense<0.000000e+00> : vector<32x32xf32>
    %46 = tpu.matmul %9, %45, %cst_30 {dimension_numbers = #tpu.dot_dimension_numbers<[1], [0], [0], [1], [0, 0, 1, 1], [], []>} : vector<32x2xf32>, vector<2x32xf32>, vector<32x32xf32> -> vector<32x32xf32>
    %cst_31 = arith.constant dense<0.000000e+00> : vector<32x32xf32>
    %47 = tpu.matmul %46, %6, %cst_31 {dimension_numbers = #tpu.dot_dimension_numbers<[1], [0], [0], [1], [0, 0, 1, 1], [], []>} : vector<32x32xf32>, vector<32x32xf32>, vector<32x32xf32> -> vector<32x32xf32>
    %48 = arith.mulf %47, %19 : vector<32x32xf32>
    %cst_32 = arith.constant dense<0.000000e+00> : vector<32x5xf32>
    %49 = tpu.matmul %48, %3, %cst_32 {dimension_numbers = #tpu.dot_dimension_numbers<[1], [0], [0], [1], [0, 0, 1, 1], [], []>} : vector<32x32xf32>, vector<32x5xf32>, vector<32x5xf32> -> vector<32x5xf32>
    %cst_33 = arith.constant 0.000000e+00 : f32
    %50 = vector.broadcast %cst_33 : f32 to vector<32x5xf32>
    %51 = arith.select %12, %50, %49 : vector<32x5xi1>, vector<32x5xf32>
    %52 = arith.mulf %51, %51 : vector<32x5xf32>
    %53 = vector.shape_cast %52 : vector<32x5xf32> to vector<1x32x5xf32>
    %cst_34 = arith.constant dense<0.000000e+00> : vector<1xf32>
    %54 = vector.multi_reduction <add>, %53, %cst_34 [1, 2] : vector<1x32x5xf32> to vector<1xf32>
    %55 = vector.shape_cast %54 : vector<1xf32> to vector<1x1x1xf32>
    %56 = vector.extract %55[0, 0, 0] : f32 from vector<1x1x1xf32>
    %57 = math.sqrt %56 : f32
    %cst_35 = arith.constant 1.000000e-01 : f32
    %58 = vector.broadcast %cst_35 : f32 to vector<32x5xf32>
    %59 = arith.mulf %58, %49 : vector<32x5xf32>
    %60 = arith.subf %1, %59 : vector<32x5xf32>
    %cst_36 = arith.constant 0.000000e+00 : f32
    %cst_37 = arith.constant 1.000000e+00 : f32
    %61 = vector.broadcast %cst_36 : f32 to vector<32x5xf32>
    %62 = arith.maximumf %61, %60 : vector<32x5xf32>
    %63 = vector.broadcast %cst_37 : f32 to vector<32x5xf32>
    %64 = arith.minimumf %63, %62 : vector<32x5xf32>
    %65 = arith.select %12, %64, %60 : vector<32x5xi1>, vector<32x5xf32>
    %c0_38 = arith.constant 0 : index
    %c0_39 = arith.constant 0 : index
    %c0_40 = arith.constant 0 : index
    %66 = vector.load %arg10[%c0_38, %c0_39, %c0_40] : memref<4x32x5xf32, #tpu.memory_space<vmem>>, vector<1x32x5xf32>
    %67 = vector.shape_cast %66 : vector<1x32x5xf32> to vector<32x5xf32>
    %68 = vector.shape_cast %65 : vector<32x5xf32> to vector<1x32x5xf32>
    tpu.vector_store %arg10[%c0_38, %c0_39, %c0_40], %68 {strides = array<i32>} : memref<4x32x5xf32, #tpu.memory_space<vmem>>, vector<1x32x5xf32>,
    %c0_41 = arith.constant 0 : index
    %69 = memref.load %arg11[%c0_41] : memref<4xf32, #tpu.memory_space<smem>>
    memref.store %39, %arg11[%c0_41] : memref<4xf32, #tpu.memory_space<smem>>
    %c0_42 = arith.constant 0 : index
    %70 = memref.load %arg12[%c0_42] : memref<4xf32, #tpu.memory_space<smem>>
    memref.store %57, %arg12[%c0_42] : memref<4xf32, #tpu.memory_space<smem>>
    %cst_43 = arith.constant dense<0.000000e+00> : vector<32x32xf32>
    %71 = tpu.matmul %65, %2, %cst_43 {dimension_numbers = #tpu.dot_dimension_numbers<[1], [0], [0], [1], [0, 0, 1, 1], [], []>} : vector<32x5xf32>, vector<5x32xf32>, vector<32x32xf32> -> vector<32x32xf32>
    %72 = vector.broadcast %4 : vector<1x32xf32> to vector<32x32xf32>
    %73 = arith.addf %71, %72 : vector<32x32xf32>
    %cst_44 = arith.constant 0.000000e+00 : f32
    %74 = vector.broadcast %cst_44 : f32 to vector<32x32xf32>
    %75 = arith.cmpf ogt, %73, %74 : vector<32x32xf32>
    %76 = arith.extui %75 : vector<32x32xi1> to vector<32x32xi32>
    %77 = arith.sitofp %76 : vector<32x32xi32> to vector<32x32xf32>
    %78 = arith.mulf %73, %77 : vector<32x32xf32>
    %cst_45 = arith.constant dense<0.000000e+00> : vector<32x32xf32>
    %79 = tpu.matmul %78, %5, %cst_45 {dimension_numbers = #tpu.dot_dimension_numbers<[1], [0], [0], [1], [0, 0, 1, 1], [], []>} : vector<32x32xf32>, vector<32x32xf32>, vector<32x32xf32> -> vector<32x32xf32>
    %80 = vector.broadcast %7 : vector<1x32xf32> to vector<32x32xf32>
    %81 = arith.addf %79, %80 : vector<32x32xf32>
    %cst_46 = arith.constant dense<0.000000e+00> : vector<2x32xf32>
    %82 = tpu.matmul %8, %81, %cst_46 {dimension_numbers = #tpu.dot_dimension_numbers<[1], [0], [0], [1], [0, 0, 1, 1], [], []>} : vector<2x32xf32>, vector<32x32xf32>, vector<2x32xf32> -> vector<2x32xf32>
    %83 = arith.subf %82, %0 : vector<2x32xf32>
    %84 = math.absf %83 : vector<2x32xf32>
    %cst_47 = arith.constant 1.000000e+00 : f32
    %85 = vector.broadcast %cst_47 : f32 to vector<2x32xf32>
    %86 = arith.cmpf olt, %84, %85 : vector<2x32xf32>
    %cst_48 = arith.constant 5.000000e-01 : f32
    %87 = vector.broadcast %cst_48 : f32 to vector<2x32xf32>
    %88 = arith.mulf %87, %83 : vector<2x32xf32>
    %89 = arith.mulf %88, %83 : vector<2x32xf32>
    %cst_49 = arith.constant 5.000000e-01 : f32
    %90 = vector.broadcast %cst_49 : f32 to vector<2x32xf32>
    %91 = arith.subf %84, %90 : vector<2x32xf32>
    %92 = arith.select %86, %89, %91 : vector<2x32xi1>, vector<2x32xf32>
    %93 = vector.shape_cast %92 : vector<2x32xf32> to vector<1x2x32xf32>
    %cst_50 = arith.constant dense<0.000000e+00> : vector<1xf32>
    %94 = vector.multi_reduction <add>, %93, %cst_50 [1, 2] : vector<1x2x32xf32> to vector<1xf32>
    %95 = vector.shape_cast %94 : vector<1xf32> to vector<1x1x1xf32>
    %96 = vector.extract %95[0, 0, 0] : f32 from vector<1x1x1xf32>
    %cst_51 = arith.constant 6.400000e+01 : f32
    %97 = arith.divf %96, %cst_51 : f32
    %cst_52 = arith.constant -1.000000e+00 : f32
    %cst_53 = arith.constant 1.000000e+00 : f32
    %98 = vector.broadcast %cst_52 : f32 to vector<2x32xf32>
    %99 = arith.maximumf %98, %83 : vector<2x32xf32>
    %100 = vector.broadcast %cst_53 : f32 to vector<2x32xf32>
    %101 = arith.minimumf %100, %99 : vector<2x32xf32>
    %cst_54 = arith.constant 1.562500e-02 : f32
    %102 = vector.broadcast %cst_54 : f32 to vector<2x32xf32>
    %103 = arith.mulf %101, %102 : vector<2x32xf32>
    %cst_55 = arith.constant dense<0.000000e+00> : vector<32x32xf32>
    %104 = tpu.matmul %9, %103, %cst_55 {dimension_numbers = #tpu.dot_dimension_numbers<[1], [0], [0], [1], [0, 0, 1, 1], [], []>} : vector<32x2xf32>, vector<2x32xf32>, vector<32x32xf32> -> vector<32x32xf32>
    %cst_56 = arith.constant dense<0.000000e+00> : vector<32x32xf32>
    %105 = tpu.matmul %104, %6, %cst_56 {dimension_numbers = #tpu.dot_dimension_numbers<[1], [0], [0], [1], [0, 0, 1, 1], [], []>} : vector<32x32xf32>, vector<32x32xf32>, vector<32x32xf32> -> vector<32x32xf32>
    %106 = arith.mulf %105, %77 : vector<32x32xf32>
    %cst_57 = arith.constant dense<0.000000e+00> : vector<32x5xf32>
    %107 = tpu.matmul %106, %3, %cst_57 {dimension_numbers = #tpu.dot_dimension_numbers<[1], [0], [0], [1], [0, 0, 1, 1], [], []>} : vector<32x32xf32>, vector<32x5xf32>, vector<32x5xf32> -> vector<32x5xf32>
    %cst_58 = arith.constant 0.000000e+00 : f32
    %108 = vector.broadcast %cst_58 : f32 to vector<32x5xf32>
    %109 = arith.select %12, %108, %107 : vector<32x5xi1>, vector<32x5xf32>
    %110 = arith.mulf %109, %109 : vector<32x5xf32>
    %111 = vector.shape_cast %110 : vector<32x5xf32> to vector<1x32x5xf32>
    %cst_59 = arith.constant dense<0.000000e+00> : vector<1xf32>
    %112 = vector.multi_reduction <add>, %111, %cst_59 [1, 2] : vector<1x32x5xf32> to vector<1xf32>
    %113 = vector.shape_cast %112 : vector<1xf32> to vector<1x1x1xf32>
    %114 = vector.extract %113[0, 0, 0] : f32 from vector<1x1x1xf32>
    %115 = math.sqrt %114 : f32
    %cst_60 = arith.constant 1.000000e-01 : f32
    %116 = vector.broadcast %cst_60 : f32 to vector<32x5xf32>
    %117 = arith.mulf %116, %107 : vector<32x5xf32>
    %118 = arith.subf %65, %117 : vector<32x5xf32>
    %cst_61 = arith.constant 0.000000e+00 : f32
    %cst_62 = arith.constant 1.000000e+00 : f32
    %119 = vector.broadcast %cst_61 : f32 to vector<32x5xf32>
    %120 = arith.maximumf %119, %118 : vector<32x5xf32>
    %121 = vector.broadcast %cst_62 : f32 to vector<32x5xf32>
    %122 = arith.minimumf %121, %120 : vector<32x5xf32>
    %123 = arith.select %12, %122, %118 : vector<32x5xi1>, vector<32x5xf32>
    %c1 = arith.constant 1 : index
    %c0_63 = arith.constant 0 : index
    %c0_64 = arith.constant 0 : index
    %124 = vector.load %arg10[%c1, %c0_63, %c0_64] : memref<4x32x5xf32, #tpu.memory_space<vmem>>, vector<1x32x5xf32>
    %125 = vector.shape_cast %124 : vector<1x32x5xf32> to vector<32x5xf32>
    %126 = vector.shape_cast %123 : vector<32x5xf32> to vector<1x32x5xf32>
    tpu.vector_store %arg10[%c1, %c0_63, %c0_64], %126 {strides = array<i32>} : memref<4x32x5xf32, #tpu.memory_space<vmem>>, vector<1x32x5xf32>,
    %c1_65 = arith.constant 1 : index
    %127 = memref.load %arg11[%c1_65] : memref<4xf32, #tpu.memory_space<smem>>
    memref.store %97, %arg11[%c1_65] : memref<4xf32, #tpu.memory_space<smem>>
    %c1_66 = arith.constant 1 : index
    %128 = memref.load %arg12[%c1_66] : memref<4xf32, #tpu.memory_space<smem>>
    memref.store %115, %arg12[%c1_66] : memref<4xf32, #tpu.memory_space<smem>>
    %cst_67 = arith.constant dense<0.000000e+00> : vector<32x32xf32>
    %129 = tpu.matmul %123, %2, %cst_67 {dimension_numbers = #tpu.dot_dimension_numbers<[1], [0], [0], [1], [0, 0, 1, 1], [], []>} : vector<32x5xf32>, vector<5x32xf32>, vector<32x32xf32> -> vector<32x32xf32>
    %130 = vector.broadcast %4 : vector<1x32xf32> to vector<32x32xf32>
    %131 = arith.addf %129, %130 : vector<32x32xf32>
    %cst_68 = arith.constant 0.000000e+00 : f32
    %132 = vector.broadcast %cst_68 : f32 to vector<32x32xf32>
    %133 = arith.cmpf ogt, %131, %132 : vector<32x32xf32>
    %134 = arith.extui %133 : vector<32x32xi1> to vector<32x32xi32>
    %135 = arith.sitofp %134 : vector<32x32xi32> to vector<32x32xf32>
    %136 = arith.mulf %131, %135 : vector<32x32xf32>
    %cst_69 = arith.constant dense<0.000000e+00> : vector<32x32xf32>
    %137 = tpu.matmul %136, %5, %cst_69 {dimension_numbers = #tpu.dot_dimension_numbers<[1], [0], [0], [1], [0, 0, 1, 1], [], []>} : vector<32x32xf32>, vector<32x32xf32>, vector<32x32xf32> -> vector<32x32xf32>
    %138 = vector.broadcast %7 : vector<1x32xf32> to vector<32x32xf32>
    %139 = arith.addf %137, %138 : vector<32x32xf32>
    %cst_70 = arith.constant dense<0.000000e+00> : vector<2x32xf32>
    %140 = tpu.matmul %8, %139, %cst_70 {dimension_numbers = #tpu.dot_dimension_numbers<[1], [0], [0], [1], [0, 0, 1, 1], [], []>} : vector<2x32xf32>, vector<32x32xf32>, vector<2x32xf32> -> vector<2x32xf32>
    %141 = arith.subf %140, %0 : vector<2x32xf32>
    %142 = math.absf %141 : vector<2x32xf32>
    %cst_71 = arith.constant 1.000000e+00 : f32
    %143 = vector.broadcast %cst_71 : f32 to vector<2x32xf32>
    %144 = arith.cmpf olt, %142, %143 : vector<2x32xf32>
    %cst_72 = arith.constant 5.000000e-01 : f32
    %145 = vector.broadcast %cst_72 : f32 to vector<2x32xf32>
    %146 = arith.mulf %145, %141 : vector<2x32xf32>
    %147 = arith.mulf %146, %141 : vector<2x32xf32>
    %cst_73 = arith.constant 5.000000e-01 : f32
    %148 = vector.broadcast %cst_73 : f32 to vector<2x32xf32>
    %149 = arith.subf %142, %148 : vector<2x32xf32>
    %150 = arith.select %144, %147, %149 : vector<2x32xi1>, vector<2x32xf32>
    %151 = vector.shape_cast %150 : vector<2x32xf32> to vector<1x2x32xf32>
    %cst_74 = arith.constant dense<0.000000e+00> : vector<1xf32>
    %152 = vector.multi_reduction <add>, %151, %cst_74 [1, 2] : vector<1x2x32xf32> to vector<1xf32>
    %153 = vector.shape_cast %152 : vector<1xf32> to vector<1x1x1xf32>
    %154 = vector.extract %153[0, 0, 0] : f32 from vector<1x1x1xf32>
    %cst_75 = arith.constant 6.400000e+01 : f32
    %155 = arith.divf %154, %cst_75 : f32
    %cst_76 = arith.constant -1.000000e+00 : f32
    %cst_77 = arith.constant 1.000000e+00 : f32
    %156 = vector.broadcast %cst_76 : f32 to vector<2x32xf32>
    %157 = arith.maximumf %156, %141 : vector<2x32xf32>
    %158 = vector.broadcast %cst_77 : f32 to vector<2x32xf32>
    %159 = arith.minimumf %158, %157 : vector<2x32xf32>
    %cst_78 = arith.constant 1.562500e-02 : f32
    %160 = vector.broadcast %cst_78 : f32 to vector<2x32xf32>
    %161 = arith.mulf %159, %160 : vector<2x32xf32>
    %cst_79 = arith.constant dense<0.000000e+00> : vector<32x32xf32>
    %162 = tpu.matmul %9, %161, %cst_79 {dimension_numbers = #tpu.dot_dimension_numbers<[1], [0], [0], [1], [0, 0, 1, 1], [], []>} : vector<32x2xf32>, vector<2x32xf32>, vector<32x32xf32> -> vector<32x32xf32>
    %cst_80 = arith.constant dense<0.000000e+00> : vector<32x32xf32>
    %163 = tpu.matmul %162, %6, %cst_80 {dimension_numbers = #tpu.dot_dimension_numbers<[1], [0], [0], [1], [0, 0, 1, 1], [], []>} : vector<32x32xf32>, vector<32x32xf32>, vector<32x32xf32> -> vector<32x32xf32>
    %164 = arith.mulf %163, %135 : vector<32x32xf32>
    %cst_81 = arith.constant dense<0.000000e+00> : vector<32x5xf32>
    %165 = tpu.matmul %164, %3, %cst_81 {dimension_numbers = #tpu.dot_dimension_numbers<[1], [0], [0], [1], [0, 0, 1, 1], [], []>} : vector<32x32xf32>, vector<32x5xf32>, vector<32x5xf32> -> vector<32x5xf32>
    %cst_82 = arith.constant 0.000000e+00 : f32
    %166 = vector.broadcast %cst_82 : f32 to vector<32x5xf32>
    %167 = arith.select %12, %166, %165 : vector<32x5xi1>, vector<32x5xf32>
    %168 = arith.mulf %167, %167 : vector<32x5xf32>
    %169 = vector.shape_cast %168 : vector<32x5xf32> to vector<1x32x5xf32>
    %cst_83 = arith.constant dense<0.000000e+00> : vector<1xf32>
    %170 = vector.multi_reduction <add>, %169, %cst_83 [1, 2] : vector<1x32x5xf32> to vector<1xf32>
    %171 = vector.shape_cast %170 : vector<1xf32> to vector<1x1x1xf32>
    %172 = vector.extract %171[0, 0, 0] : f32 from vector<1x1x1xf32>
    %173 = math.sqrt %172 : f32
    %cst_84 = arith.constant 1.000000e-01 : f32
    %174 = vector.broadcast %cst_84 : f32 to vector<32x5xf32>
    %175 = arith.mulf %174, %165 : vector<32x5xf32>
    %176 = arith.subf %123, %175 : vector<32x5xf32>
    %cst_85 = arith.constant 0.000000e+00 : f32
    %cst_86 = arith.constant 1.000000e+00 : f32
    %177 = vector.broadcast %cst_85 : f32 to vector<32x5xf32>
    %178 = arith.maximumf %177, %176 : vector<32x5xf32>
    %179 = vector.broadcast %cst_86 : f32 to vector<32x5xf32>
    %180 = arith.minimumf %179, %178 : vector<32x5xf32>
    %181 = arith.select %12, %180, %176 : vector<32x5xi1>, vector<32x5xf32>
    %c2 = arith.constant 2 : index
    %c0_87 = arith.constant 0 : index
    %c0_88 = arith.constant 0 : index
    %182 = vector.load %arg10[%c2, %c0_87, %c0_88] : memref<4x32x5xf32, #tpu.memory_space<vmem>>, vector<1x32x5xf32>
    %183 = vector.shape_cast %182 : vector<1x32x5xf32> to vector<32x5xf32>
    %184 = vector.shape_cast %181 : vector<32x5xf32> to vector<1x32x5xf32>
    tpu.vector_store %arg10[%c2, %c0_87, %c0_88], %184 {strides = array<i32>} : memref<4x32x5xf32, #tpu.memory_space<vmem>>, vector<1x32x5xf32>,
    %c2_89 = arith.constant 2 : index
    %185 = memref.load %arg11[%c2_89] : memref<4xf32, #tpu.memory_space<smem>>
    memref.store %155, %arg11[%c2_89] : memref<4xf32, #tpu.memory_space<smem>>
    %c2_90 = arith.constant 2 : index
    %186 = memref.load %arg12[%c2_90] : memref<4xf32, #tpu.memory_space<smem>>
    memref.store %173, %arg12[%c2_90] : memref<4xf32, #tpu.memory_space<smem>>
    %cst_91 = arith.constant dense<0.000000e+00> : vector<32x32xf32>
    %187 = tpu.matmul %181, %2, %cst_91 {dimension_numbers = #tpu.dot_dimension_numbers<[1], [0], [0], [1], [0, 0, 1, 1], [], []>} : vector<32x5xf32>, vector<5x32xf32>, vector<32x32xf32> -> vector<32x32xf32>
    %188 = vector.broadcast %4 : vector<1x32xf32> to vector<32x32xf32>
    %189 = arith.addf %187, %188 : vector<32x32xf32>
    %cst_92 = arith.constant 0.000000e+00 : f32
    %190 = vector.broadcast %cst_92 : f32 to vector<32x32xf32>
    %191 = arith.cmpf ogt, %189, %190 : vector<32x32xf32>
    %192 = arith.extui %191 : vector<32x32xi1> to vector<32x32xi32>
    %193 = arith.sitofp %192 : vector<32x32xi32> to vector<32x32xf32>
    %194 = arith.mulf %189, %193 : vector<32x32xf32>
    %cst_93 = arith.constant dense<0.000000e+00> : vector<32x32xf32>
    %195 = tpu.matmul %194, %5, %cst_93 {dimension_numbers = #tpu.dot_dimension_numbers<[1], [0], [0], [1], [0, 0, 1, 1], [], []>} : vector<32x32xf32>, vector<32x32xf32>, vector<32x32xf32> -> vector<32x32xf32>
    %196 = vector.broadcast %7 : vector<1x32xf32> to vector<32x32xf32>
    %197 = arith.addf %195, %196 : vector<32x32xf32>
    %cst_94 = arith.constant dense<0.000000e+00> : vector<2x32xf32>
    %198 = tpu.matmul %8, %197, %cst_94 {dimension_numbers = #tpu.dot_dimension_numbers<[1], [0], [0], [1], [0, 0, 1, 1], [], []>} : vector<2x32xf32>, vector<32x32xf32>, vector<2x32xf32> -> vector<2x32xf32>
    %199 = arith.subf %198, %0 : vector<2x32xf32>
    %200 = math.absf %199 : vector<2x32xf32>
    %cst_95 = arith.constant 1.000000e+00 : f32
    %201 = vector.broadcast %cst_95 : f32 to vector<2x32xf32>
    %202 = arith.cmpf olt, %200, %201 : vector<2x32xf32>
    %cst_96 = arith.constant 5.000000e-01 : f32
    %203 = vector.broadcast %cst_96 : f32 to vector<2x32xf32>
    %204 = arith.mulf %203, %199 : vector<2x32xf32>
    %205 = arith.mulf %204, %199 : vector<2x32xf32>
    %cst_97 = arith.constant 5.000000e-01 : f32
    %206 = vector.broadcast %cst_97 : f32 to vector<2x32xf32>
    %207 = arith.subf %200, %206 : vector<2x32xf32>
    %208 = arith.select %202, %205, %207 : vector<2x32xi1>, vector<2x32xf32>
    %209 = vector.shape_cast %208 : vector<2x32xf32> to vector<1x2x32xf32>
    %cst_98 = arith.constant dense<0.000000e+00> : vector<1xf32>
    %210 = vector.multi_reduction <add>, %209, %cst_98 [1, 2] : vector<1x2x32xf32> to vector<1xf32>
    %211 = vector.shape_cast %210 : vector<1xf32> to vector<1x1x1xf32>
    %212 = vector.extract %211[0, 0, 0] : f32 from vector<1x1x1xf32>
    %cst_99 = arith.constant 6.400000e+01 : f32
    %213 = arith.divf %212, %cst_99 : f32
    %cst_100 = arith.constant -1.000000e+00 : f32
    %cst_101 = arith.constant 1.000000e+00 : f32
    %214 = vector.broadcast %cst_100 : f32 to vector<2x32xf32>
    %215 = arith.maximumf %214, %199 : vector<2x32xf32>
    %216 = vector.broadcast %cst_101 : f32 to vector<2x32xf32>
    %217 = arith.minimumf %216, %215 : vector<2x32xf32>
    %cst_102 = arith.constant 1.562500e-02 : f32
    %218 = vector.broadcast %cst_102 : f32 to vector<2x32xf32>
    %219 = arith.mulf %217, %218 : vector<2x32xf32>
    %cst_103 = arith.constant dense<0.000000e+00> : vector<32x32xf32>
    %220 = tpu.matmul %9, %219, %cst_103 {dimension_numbers = #tpu.dot_dimension_numbers<[1], [0], [0], [1], [0, 0, 1, 1], [], []>} : vector<32x2xf32>, vector<2x32xf32>, vector<32x32xf32> -> vector<32x32xf32>
    %cst_104 = arith.constant dense<0.000000e+00> : vector<32x32xf32>
    %221 = tpu.matmul %220, %6, %cst_104 {dimension_numbers = #tpu.dot_dimension_numbers<[1], [0], [0], [1], [0, 0, 1, 1], [], []>} : vector<32x32xf32>, vector<32x32xf32>, vector<32x32xf32> -> vector<32x32xf32>
    %222 = arith.mulf %221, %193 : vector<32x32xf32>
    %cst_105 = arith.constant dense<0.000000e+00> : vector<32x5xf32>
    %223 = tpu.matmul %222, %3, %cst_105 {dimension_numbers = #tpu.dot_dimension_numbers<[1], [0], [0], [1], [0, 0, 1, 1], [], []>} : vector<32x32xf32>, vector<32x5xf32>, vector<32x5xf32> -> vector<32x5xf32>
    %cst_106 = arith.constant 0.000000e+00 : f32
    %224 = vector.broadcast %cst_106 : f32 to vector<32x5xf32>
    %225 = arith.select %12, %224, %223 : vector<32x5xi1>, vector<32x5xf32>
    %226 = arith.mulf %225, %225 : vector<32x5xf32>
    %227 = vector.shape_cast %226 : vector<32x5xf32> to vector<1x32x5xf32>
    %cst_107 = arith.constant dense<0.000000e+00> : vector<1xf32>
    %228 = vector.multi_reduction <add>, %227, %cst_107 [1, 2] : vector<1x32x5xf32> to vector<1xf32>
    %229 = vector.shape_cast %228 : vector<1xf32> to vector<1x1x1xf32>
    %230 = vector.extract %229[0, 0, 0] : f32 from vector<1x1x1xf32>
    %231 = math.sqrt %230 : f32
    %cst_108 = arith.constant 1.000000e-01 : f32
    %232 = vector.broadcast %cst_108 : f32 to vector<32x5xf32>
    %233 = arith.mulf %232, %223 : vector<32x5xf32>
    %234 = arith.subf %181, %233 : vector<32x5xf32>
    %cst_109 = arith.constant 0.000000e+00 : f32
    %cst_110 = arith.constant 1.000000e+00 : f32
    %235 = vector.broadcast %cst_109 : f32 to vector<32x5xf32>
    %236 = arith.maximumf %235, %234 : vector<32x5xf32>
    %237 = vector.broadcast %cst_110 : f32 to vector<32x5xf32>
    %238 = arith.minimumf %237, %236 : vector<32x5xf32>
    %239 = arith.select %12, %238, %234 : vector<32x5xi1>, vector<32x5xf32>
    %c3 = arith.constant 3 : index
    %c0_111 = arith.constant 0 : index
    %c0_112 = arith.constant 0 : index
    %240 = vector.load %arg10[%c3, %c0_111, %c0_112] : memref<4x32x5xf32, #tpu.memory_space<vmem>>, vector<1x32x5xf32>
    %241 = vector.shape_cast %240 : vector<1x32x5xf32> to vector<32x5xf32>
    %242 = vector.shape_cast %239 : vector<32x5xf32> to vector<1x32x5xf32>
    tpu.vector_store %arg10[%c3, %c0_111, %c0_112], %242 {strides = array<i32>} : memref<4x32x5xf32, #tpu.memory_space<vmem>>, vector<1x32x5xf32>,
    %c3_113 = arith.constant 3 : index
    %243 = memref.load %arg11[%c3_113] : memref<4xf32, #tpu.memory_space<smem>>
    memref.store %213, %arg11[%c3_113] : memref<4xf32, #tpu.memory_space<smem>>
    %c3_114 = arith.constant 3 : index
    %244 = memref.load %arg12[%c3_114] : memref<4xf32, #tpu.memory_space<smem>>
    memref.store %231, %arg12[%c3_114] : memref<4xf32, #tpu.memory_space<smem>>
    return
  }
}

</mosaic_0001>

<bundles_post_ra>
// kernel: tpu_custom_call.1
= control target key start
LH: loop header
LB: loop body
LE: loop exit
PB: predicated region body
PF: predicated region fallthrough
CT: control target
= control target key end

     0   :  { %18 = vsyncpa [#allocation3], 0  ;;  %vm87_vm0 = vcmask 1044480   ;;  %vm74_vm1 = vcmask 39936   ;;  %s4239_s0 = inlined_call_operand.vmem [shape: f32[2,32], index: 0, kind: input, shape index: {}]   ;;  %s4240_s1 = inlined_call_operand.vmem [shape: f32[32,5], index: 1, kind: input, shape index: {}]   ;;  %s4241_s2 = inlined_call_operand.vmem [shape: f32[5,32], index: 2, kind: input, shape index: {}]   ;;  %s4242_s3 = inlined_call_operand.vmem [shape: f32[32,5], index: 3, kind: input, shape index: {}]   ;;  %s4243_s4 = inlined_call_operand.vmem [shape: f32[1,32], index: 4, kind: input, shape index: {}]   ;;  %s4244_s5 = inlined_call_operand.vmem [shape: f32[32,32], index: 5, kind: input, shape index: {}]   ;;  %s4245_s6 = inlined_call_operand.vmem [shape: f32[32,32], index: 6, kind: input, shape index: {}]   ;;  %s4246_s7 = inlined_call_operand.vmem [shape: f32[1,32], index: 7, kind: input, shape index: {}]   ;;  %s4247_s8 = inlined_call_operand.vmem [shape: f32[2,32], index: 8, kind: input, shape index: {}]   ;;  %s4248_s9 = inlined_call_operand.vmem [shape: f32[32,2], index: 9, kind: input, shape index: {}]   ;;  %s4249_s10 = inlined_call_operand.vmem [shape: f32[4,32,5], index: 10, kind: output, shape index: {0}]   ;;  %s4250_s11 = inlined_call_operand.hbm [shape: f32[4], index: 11, kind: output, shape index: {1}]   ;;  %s4251_s12 = inlined_call_operand.hbm [shape: f32[4], index: 12, kind: output, shape index: {2}]  }
   0x1   :  { %v3564_v0 = vld [vmem:[%s4241_s2] sm:$0x1f]  ;;  %v3574_v2 = vld [vmem:[%s4240_s1 + $0x8] sm:$0xff]  ;;  %v3583_v3 = vld [vmem:[%s4240_s1 + $0x10] sm:$0xff] }
   0x2   :  { %v3569_v1 = vld [vmem:[%s4240_s1] sm:$0xff]  ;;  %3022 = vmatprep.subr.msk.mxu0 %vm87_vm0, %v3564_v0 }
   0x3   :  { %3024 = vmatprep.mubr.msk.f32.mxu0 %vm74_vm1, %v3569_v1 }
   0x4   :  { %19 = vsyncpa [#allocation5], 0  ;;  %3023 = vmatpush3.msk.msra.mxu0 %vm87_vm0, %v3564_v0  ;;  %v3594_v4 = vld [vmem:[%s4240_s1 + $0x18] sm:$0xff]  ;;  %v51_v5 = vld [vmem:[%s4244_s5] sm:$0xff]  ;;  %v3491_v16 = vmov 0.0   ;;  %vm198_vm4 = vcmask 261120  }
   0x5   :  { %3025 = vmatmul.mubr.msk.f32.vlgmr.msra.gmra.mrb[0].mxu0 %vm74_vm1, %v3574_v2  ;;  %v52_v6 = vld [vmem:[%s4244_s5 + $0x8] sm:$0xff]  ;;  %v53_v8 = vld [vmem:[%s4244_s5 + $0x10] sm:$0xff]  ;;  %v54_v9 = vld [vmem:[%s4244_s5 + $0x18] sm:$0xff]  ;;  %v3492_v29 = vmov 0.0|0.0   ;;  %vm3493_vm7 = vmmov 0   ;;  %vm393_vm8 = vcmask 15360  }
   0x6   :  { %3027 = vmatprep.mubr.msk.f32.mxu0 %vm74_vm1, %v3583_v3  ;;  %v3604_v7 = vpack.c.bf16 %v52_v6, %v51_v5  ;;  %v3614_v10 = vpack.c.bf16 %v54_v9, %v53_v8  ;;  %v3621_v11 = vld [vmem:[%s4243_s4] ss:$0 sm:$0xff]  ;;  %3306 = vmatprep.subr.bf16.mxu0 %v3492_v29  ;;  %vm406_vm9 = vcmask 1041408   ;;  %vm376_vm10 = vcmask 254976   ;;  %v3683_v53 = vld [vmem:[%s4248_s9 + $0x8] sm:$0xff]  ;;  %v3689_v55 = vld [vmem:[%s4248_s9 + $0x10] sm:$0xff] }
   0x7   :  { %v3653_v30 = vld [vmem:[%s4246_s7] ss:$0 sm:$0xff]  ;;  %v3700_v57 = vld [vmem:[%s4248_s9 + $0x18] sm:$0xff]  ;;  %v56_v59 = vld [vmem:[%s4245_s6 + $0x8] sm:$0xff] }
   0x8   :  { %3299 = vmatprep.subr.bf16.mxu1 %v3604_v7  ;;  %v3663_v41 = vld [vmem:[%s4247_s8] sm:$0x3]  ;;  %v57_v61 = vld [vmem:[%s4245_s6 + $0x10] sm:$0xff]  ;;  %v58_v62 = vld [vmem:[%s4245_s6 + $0x18] sm:$0xff] }
   0x9   :  { %3028 = vmatmul.mubr.msk.f32.gmra.mrb[2].mxu0 %vm74_vm1, %v3594_v4  ;;  %3301 = vmatpush3.bf16.msra.mxu1 %v3604_v7  ;;  %v3670_v42 = vld [vmem:[%s4248_s9] sm:$0xff]  ;;  %v3720_v63 = vpack.c.bf16 %v58_v62, %v57_v61  ;;  %v47_v6 = vld [vmem:[%s4242_s3 + $0x8] sm:$0xff] }
   0xa   :  { %3303 = vmatprep.subr.bf16.mxu1 %v3614_v10  ;;  %3052 = vmatprep.mubr.msk.f32.mxu0 %vm3493_vm7, %v3491_v16  ;;  %v3677_v43 = vld [vmem:[%s4239_s0] sm:$0x3] }
   0xb   :  { %v55_v58 = vld [vmem:[%s4245_s6] sm:$0xff] }
   0xc   :  { %v3710_v60 = vpack.c.bf16 %v56_v59, %v55_v58  ;;  %v46_v5 = vld [vmem:[%s4242_s3] sm:$0xff] }
   0xd   :  { %3305 = vmatpush3.bf16.msra.mxu1 %v3614_v10  ;;  %v3732_v8 = vpack.c.bf16 %v47_v6, %v46_v5 }
   0xe   :  { %3313 = vmatprep.subr.bf16.mxu1 %v3710_v60 }
  0xd8   :  { %v3026_v12 = vpop.f32.mrb[0].mxu0 }
  0xd9   :  { %v163_v13 = vadd.f32 %v3026_v12, %v3621_v11  ;;  %v157_v14 = vpop.f32.mrb[1].mxu0 }
  0xda   :  { %v158_v15 = vadd.f32 %v3621_v11, %v157_v14 }
  0xdb   :  { %vm177_vm2 = vcmp.gt.f32.partialorder %v163_v13, 0.0 }
  0xdc   :  { %v3626_v17 = vsel %vm177_vm2, 1.0, %v3491_v16  ;;  %vm176_vm3 = vcmp.gt.f32.partialorder %v158_v15, 0.0  ;;  %v3029_v18 = vpop.f32.mrb[2].mxu0 }
  0xdd   :  { %v173_v19 = vadd.f32 %v3029_v18, %v3621_v11  ;;  %v167_v20 = vpop.f32.mrb[3].mxu0  ;;  %v3630_v21 = vsel %vm176_vm3, 1.0, %v3491_v16  ;;  %v189_v24 = vmul.f32 %v3626_v17, %v163_v13 }
  0xde   :  { %v168_v22 = vadd.f32 %v3621_v11, %v167_v20  ;;  %v188_v23 = vmul.f32 %v3630_v21, %v158_v15 }
  0xdf   :  { %vm179_vm5 = vcmp.gt.f32.partialorder %v173_v19, 0.0 }
  0xe0   :  { %v3636_v25 = vsel %vm179_vm5, 1.0, %v3491_v16  ;;  %vm178_vm6 = vcmp.gt.f32.partialorder %v168_v22, 0.0  ;;  %3038 = vmatprep.mubr.msk.f32.mxu1 %vm198_vm4, %v188_v23 }
  0xe1   :  { %v3640_v26 = vsel %vm178_vm6, 1.0, %v3491_v16  ;;  %3039 = vmatmul.mubr.msk.f32.vlgmr.msra.gmra.mrb[0].mxu1 %vm198_vm4, %v189_v24  ;;  %v191_v28 = vmul.f32 %v3636_v25, %v173_v19 }
  0xe2   :  { %v190_v27 = vmul.f32 %v3640_v26, %v168_v22  ;;  %3315 = vmatpush3.bf16.msra.mxu1 %v3710_v60 }
  0xe3   :  { %3317 = vmatprep.subr.bf16.mxu1 %v3720_v63 }
  0xe4   :  { %3041 = vmatprep.mubr.msk.f32.mxu1 %vm198_vm4, %v190_v27  ;;  %v48_v27 = vld [vmem:[%s4242_s3 + $0x10] sm:$0xff] }
  0xe5   :  { %3042 = vmatmul.mubr.msk.f32.gmra.mrb[2].mxu1 %vm198_vm4, %v191_v28  ;;  %v49_v28 = vld [vmem:[%s4242_s3 + $0x18] sm:$0xff] }
  0xe6   :  { %3319 = vmatpush3.bf16.msra.mxu1 %v3720_v63 }
  0xe7   :  { %3091 = vmatprep.subr.msk.mxu1 %vm87_vm0, %v3564_v0 }
 0x1b4   :  { %v3040_v31 = vpop.f32.mrb[0].mxu1 }
 0x1b5   :  { %v283_v32 = vadd.f32 %v3040_v31, %v3653_v30  ;;  %v277_v33 = vpop.f32.mrb[1].mxu1  ;;  %v3749_v31 = vpack.c.bf16 %v49_v28, %v48_v27 }
 0x1b6   :  { %v278_v34 = vadd.f32 %v3653_v30, %v277_v33 }
 0x1b8   :  { %v3307_v35 = vpack.c.bf16 %v283_v32, %v278_v34  ;;  %v3043_v36 = vpop.f32.mrb[2].mxu1 }
 0x1b9   :  { %v293_v37 = vadd.f32 %v3043_v36, %v3653_v30  ;;  %v287_v38 = vpop.f32.mrb[3].mxu1 }
 0x1ba   :  { %v288_v39 = vadd.f32 %v3653_v30, %v287_v38  ;;  %3308 = vmatpush3.bf16.msra.mxu0 %v3307_v35 }
 0x1bb   :  { %3309 = vmatprep.subr.bf16.mxu0 %v3492_v29 }
 0x1bc   :  { %v3310_v40 = vpack.c.bf16 %v293_v37, %v288_v39 }
 0x1be   :  { %3311 = vmatpush3.bf16.msra.mxu0 %v3310_v40 }
 0x1c1   :  { %3053 = vmatmul.mubr.msk.f32.vlgmr.msra.gmra.mrb[4].mxu0 %vm198_vm4, %v3663_v41 }
 0x1c2   :  { %3057 = vmatprep.mubr.msk.f32.mxu0 %vm393_vm8, %v3670_v42 }
 0x294   :  { %v365_v44 = vpop.f32.mrb[4].mxu0 }
 0x295   :  { %v369_v45 = vsub.f32 %v365_v44, %v3677_v43  ;;  %v3054_v46 = vpop.f32.mrb[5].mxu0 }
 0x297   :  { %v2753_v47 = vclamps-f32 %v369_v45, 1.0  ;;  %v370_v48 = vand.u32 2147483647, %v369_v45  ;;  %v372_v49 = vmul.f32 0.5, %v369_v45 }
 0x299   :  { %v392_v50 = vmul.f32 0.015625, %v2753_v47  ;;  %vm371_vm11 = vcmp.lt.f32.partialorder %v370_v48, 1.0  ;;  %v373_v51 = vmul.f32 %v372_v49, %v369_v45  ;;  %v2752_v52 = vadd.f32 -0.5, %v370_v48 }
 0x29b   :  { %3055 = vmatprep.subr.msk.mxu0 %vm406_vm9, %v392_v50  ;;  %v375_v54 = vsel %vm371_vm11, %v373_v51, %v2752_v52 }
 0x29c   :  { %3056 = vmatpush3.msk.msra.mxu0 %vm406_vm9, %v392_v50  ;;  %v377_v56 = vsel %vm376_vm10, %v375_v54, 0.0 }
 0x29d   :  { %3058 = vmatmul.mubr.msk.f32.vlgmr.msra.gmra.mrb[6].mxu0 %vm393_vm8, %v3683_v53  ;;  %378 = vadd.xlane.f32.xlu0 %v377_v56 }
 0x29e   :  { %3060 = vmatprep.mubr.msk.f32.mxu0 %vm393_vm8, %v3689_v55  ;;  %3321 = vmatprep.subr.bf16.mxu0 %v3732_v8 }
 0x29f   :  { %3323 = vmatpush3.bf16.msra.mxu0 %v3732_v8 }
 0x2a0   :  { %3325 = vmatprep.subr.bf16.mxu0 %v3749_v31 }
 0x2a1   :  { %3061 = vmatmul.mubr.msk.f32.gmra.mrb[8].mxu0 %vm393_vm8, %v3700_v57 }
 0x2a3   :  { %3327 = vmatpush3.bf16.msra.mxu0 %v3749_v31 }
 0x2a4   :  { %3329 = vmatprep.subr.bf16.mxu0 %v3604_v7 }
 0x32a   :  { %v379_v9 = vpop.xlane.xlu0 %378 }
 0x32b   :  { %v380_v12 = vrot.slane %v379_v9, 4 }
 0x32d   :  { %v381_v13 = vadd.f32 %v380_v12, %v379_v9 }
 0x32f   :  { %v382_v14 = vrot.slane %v381_v13, 2 }
 0x331   :  { %v383_v15 = vadd.f32 %v382_v14, %v381_v13 }
 0x333   :  { %v384_v18 = vrot.slane %v383_v15, 1 }
 0x335   :  { %v385_v19 = vadd.f32 %v384_v18, %v383_v15 }
 0x337   :  { %3422 = vpush %v385_v19 }
 0x368   :  { %s3423_s6 = spop %3422 }
 0x369   :  { %s389_s25 = smul.f32 0.015625, %s3423_s6 }
 0x36b   :  { %751 = sst [smem:[#allocation2]] %s389_s25 }
 0x370   :  { %v3059_v20 = vpop.f32.mrb[6].mxu0 }
 0x371   :  { %v476_v22 = vpop.f32.mrb[7].mxu0 }
 0x372   :  { %3071 = vmatprep.mubr.msk.f32.mxu1 %vm198_vm4, %v476_v22 }
 0x373   :  { %3072 = vmatmul.mubr.msk.f32.vlgmr.msra.gmra.mrb[4].mxu1 %vm198_vm4, %v3059_v20 }
 0x374   :  { %v3062_v23 = vpop.f32.mrb[8].mxu0  ;;  %3092 = vmatpush3.msk.msra.mxu1 %vm87_vm0, %v3564_v0 }
 0x375   :  { %v486_v24 = vpop.f32.mrb[9].mxu0  ;;  %3336 = vmatprep.subr.bf16.mxu1 %v3492_v29 }
 0x376   :  { %3074 = vmatprep.mubr.msk.f32.mxu1 %vm198_vm4, %v486_v24 }
 0x377   :  { %3075 = vmatmul.mubr.msk.f32.gmra.mrb[6].mxu1 %vm198_vm4, %v3062_v23 }
 0x446   :  { %v3073_v32 = vpop.f32.mrb[4].mxu1 }
 0x447   :  { %v573_v33 = vpop.f32.mrb[5].mxu1  ;;  %v593_v35 = vmul.f32 %v3073_v32, %v3626_v17  ;;  %v65_v17 = vlaneseq }
 0x448   :  { %v592_v34 = vmul.f32 %v3630_v21, %v573_v33 }
 0x449   :  { %v3766_v21 = vand.u32 127, %v65_v17 }
 0x44a   :  { %v3076_v36 = vpop.f32.mrb[6].mxu1  ;;  %3085 = vmatprep.mubr.msk.f32.mxu0 %vm198_vm4, %v592_v34 }
 0x44b   :  { %v583_v37 = vpop.f32.mrb[7].mxu1  ;;  %3086 = vmatmul.mubr.msk.f32.vlgmr.msra.gmra.mrb[10].mxu0 %vm198_vm4, %v593_v35  ;;  %v595_v39 = vmul.f32 %v3076_v36, %v3636_v25  ;;  %vm67_vm12 = vcmp.eq.s32.totalorder %v3766_v21, 4 }
 0x44c   :  { %v594_v38 = vmul.f32 %v3640_v26, %v583_v37  ;;  %3331 = vmatpush3.bf16.msra.mxu0 %v3604_v7 }
 0x44d   :  { %3333 = vmatprep.subr.bf16.mxu0 %v3614_v10 }
 0x44e   :  { %3088 = vmatprep.mubr.msk.f32.mxu0 %vm198_vm4, %v594_v38 }
 0x44f   :  { %3089 = vmatmul.mubr.msk.f32.gmra.mrb[12].mxu0 %vm198_vm4, %v595_v39 }
 0x450   :  { %3335 = vmatpush3.bf16.msra.mxu0 %v3614_v10 }
 0x451   :  { %3343 = vmatprep.subr.bf16.mxu0 %v3710_v60 }
 0x51e   :  { %v3087_v26 = vpop.f32.mrb[10].mxu0 }
 0x51f   :  { %v694_v40 = vsel %vm67_vm12, 0.0, %v3087_v26  ;;  %v727_v25 = vmul.f32 0.1, %v3087_v26  ;;  %v674_v44 = vpop.f32.mrb[11].mxu0 }
 0x520   :  { %v698_v45 = vmul.f32 %v694_v40, %v694_v40  ;;  %v693_v46 = vsel %vm67_vm12, 0.0, %v674_v44  ;;  %v726_v47 = vmul.f32 0.1, %v674_v44 }
 0x521   :  { %v731_v48 = vsub.f32 %v3574_v2, %v727_v25  ;;  %v697_v49 = vmul.f32 %v693_v46, %v693_v46 }
 0x522   :  { %v702_v50 = vsel %vm74_vm1, %v698_v45, 0.0  ;;  %v730_v51 = vsub.f32 %v3569_v1, %v726_v47  ;;  %v3090_v52 = vpop.f32.mrb[12].mxu0 }
 0x523   :  { %v735_v54 = vmax.f32 %v731_v48, 0.0  ;;  %v701_v56 = vsel %vm74_vm1, %v697_v49, 0.0  ;;  %v696_v58 = vsel %vm67_vm12, 0.0, %v3090_v52  ;;  %v729_v59 = vmul.f32 0.1, %v3090_v52  ;;  %v684_v61 = vpop.f32.mrb[13].mxu0 }
 0x524   :  { %v703_v62 = vadd.f32 %v702_v50, %v701_v56  ;;  %v734_v5 = vmax.f32 %v730_v51, 0.0  ;;  %v700_v6 = vmul.f32 %v696_v58, %v696_v58  ;;  %v695_v2 = vsel %vm67_vm12, 0.0, %v684_v61 }
 0x525   :  { %v739_v9 = vmin.f32 %v735_v54, 1.0  ;;  %v733_v12 = vsub.f32 %v3594_v4, %v729_v59  ;;  %v699_v13 = vmul.f32 %v695_v2, %v695_v2  ;;  %v728_v1 = vmul.f32 0.1, %v684_v61 }
 0x526   :  { %v738_v14 = vmin.f32 %v734_v5, 1.0 }
 0x527   :  { %v3784_v15 = vsel %vm67_vm12, %v739_v9, %v731_v48  ;;  %v737_v18 = vmax.f32 %v733_v12, 0.0  ;;  %v704_v19 = vsel %vm74_vm1, %v699_v13, 0.0  ;;  %v732_v20 = vsub.f32 %v3583_v3, %v728_v1 }
 0x528   :  { %747 = vst.msk [vmem:[%s4249_s10 + $0x8] sm:$0xff] %vm74_vm1, %v3784_v15  ;;  %v3795_v4 = vsel %vm67_vm12, %v738_v14, %v730_v51  ;;  %v705_v22 = vadd.f32 %v704_v19, %v703_v62  ;;  %v706_v3 = vsel %vm74_vm1, %v700_v6, 0.0 }
 0x529   :  { %v741_v23 = vmin.f32 %v737_v18, 1.0  ;;  %v736_v24 = vmax.f32 %v732_v20, 0.0  ;;  %746 = vst.msk [vmem:[%s4249_s10] sm:$0xff] %vm74_vm1, %v3795_v4  ;;  %3093 = vmatprep.mubr.msk.f32.mxu1 %vm74_vm1, %v3795_v4 }
 0x52a   :  { %3094 = vmatmul.mubr.msk.f32.vlgmr.msra.gmra.mrb[8].mxu1 %vm74_vm1, %v3784_v15  ;;  %v707_v27 = vadd.f32 %v706_v3, %v705_v22 }
 0x52b   :  { %v740_v28 = vmin.f32 %v736_v24, 1.0  ;;  %v3809_v32 = vsel %vm67_vm12, %v741_v23, %v733_v12 }
 0x52c   :  { %708 = vadd.xlane.f32.xlu0 %v707_v27  ;;  %749 = vst.msk [vmem:[%s4249_s10 + $0x18] sm:$0xff] %vm74_vm1, %v3809_v32 }
 0x52d   :  { %v3818_v33 = vsel %vm67_vm12, %v740_v28, %v732_v20 }
 0x52e   :  { %748 = vst.msk [vmem:[%s4249_s10 + $0x10] sm:$0xff] %vm74_vm1, %v3818_v33  ;;  %3096 = vmatprep.mubr.msk.f32.mxu1 %vm74_vm1, %v3818_v33 }
 0x52f   :  { %3097 = vmatmul.mubr.msk.f32.gmra.mrb[10].mxu1 %vm74_vm1, %v3809_v32 }
 0x530   :  { %3121 = vmatprep.mubr.msk.f32.mxu1 %vm3493_vm7, %v3491_v16 }
 0x5b9   :  { %v709_v34 = vpop.xlane.xlu0 %708 }
 0x5ba   :  { %v710_v35 = vrot.slane %v709_v34, 4 }
 0x5bc   :  { %v711_v36 = vadd.f32 %v710_v35, %v709_v34 }
 0x5be   :  { %v712_v37 = vrot.slane %v711_v36, 2 }
 0x5c0   :  { %v713_v38 = vadd.f32 %v712_v37, %v711_v36 }
 0x5c2   :  { %v714_v39 = vrot.slane %v713_v38, 1 }
 0x5c4   :  { %v715_v17 = vadd.f32 %v714_v39, %v713_v38 }
 0x5c6   :  { %3424 = vpush %v715_v17 }
 0x5f7   :  { %s3425_s17 = spop %3424 }
 0x5f8   :  { %v717_v26 = vstv %s3425_s17 }
 0x5f9   :  { %3451 = vrsqrt.f32 %v717_v26  ;;  %vm720_vm2 = vcmp.eq.f32.partialorder %v717_v26, inf  ;;  %v723_v59 = vand.u32 2147483648, %v717_v26  ;;  %vm722_vm5 = vcmp.eq.f32.partialorder %v717_v26, 0.0 }
 0x5fd   :  { %v3095_v40 = vpop.f32.mrb[8].mxu1 }
 0x5fe   :  { %v838_v25 = vadd.f32 %v3095_v40, %v3621_v11  ;;  %v832_v44 = vpop.f32.mrb[9].mxu1 }
 0x5ff   :  { %v833_v45 = vadd.f32 %v3621_v11, %v832_v44 }
 0x600   :  { %vm852_vm13 = vcmp.gt.f32.partialorder %v838_v25, 0.0 }
 0x601   :  { %v3834_v46 = vsel %vm852_vm13, 1.0, %v3491_v16  ;;  %vm851_vm14 = vcmp.gt.f32.partialorder %v833_v45, 0.0 }
 0x602   :  { %v3837_v47 = vsel %vm851_vm14, 1.0, %v3491_v16  ;;  %v3098_v48 = vpop.f32.mrb[10].mxu1  ;;  %v864_v54 = vmul.f32 %v3834_v46, %v838_v25 }
 0x603   :  { %v3452_v49 = vpop.eup %3451  ;;  %v863_v50 = vmul.f32 %v3837_v47, %v833_v45  ;;  %v848_v51 = vadd.f32 %v3098_v48, %v3621_v11  ;;  %v842_v52 = vpop.f32.mrb[11].mxu1 }
 0x604   :  { %v843_v56 = vadd.f32 %v3621_v11, %v842_v52  ;;  %v719_v58 = vmul.f32 %v3452_v49, %v717_v26 }
 0x605   :  { %vm854_vm15 = vcmp.gt.f32.partialorder %v848_v51, 0.0  ;;  %3107 = vmatprep.mubr.msk.f32.mxu0 %vm198_vm4, %v863_v50 }
 0x606   :  { %v3845_v61 = vsel %vm854_vm15, 1.0, %v3491_v16  ;;  %vm853_vm3 = vcmp.gt.f32.partialorder %v843_v56, 0.0  ;;  %3108 = vmatmul.mubr.msk.f32.vlgmr.msra.gmra.mrb[14].mxu0 %vm198_vm4, %v864_v54  ;;  %v721_v62 = vsel %vm720_vm2, %v717_v26, %v719_v58 }
 0x607   :  { %v3849_v5 = vsel %vm853_vm3, 1.0, %v3491_v16  ;;  %v724_v6 = vsel %vm722_vm5, %v723_v59, %v721_v62  ;;  %3345 = vmatpush3.bf16.msra.mxu0 %v3710_v60  ;;  %v866_v9 = vmul.f32 %v3845_v61, %v848_v51 }
 0x608   :  { %v865_v2 = vmul.f32 %v3849_v5, %v843_v56  ;;  %3426 = vpush %v724_v6  ;;  %3347 = vmatprep.subr.bf16.mxu0 %v3720_v63 }
 0x60a   :  { %3110 = vmatprep.mubr.msk.f32.mxu0 %vm198_vm4, %v865_v2 }
 0x60b   :  { %3111 = vmatmul.mubr.msk.f32.gmra.mrb[16].mxu0 %vm198_vm4, %v866_v9 }
 0x60c   :  { %3349 = vmatpush3.bf16.msra.mxu0 %v3720_v63 }
 0x60d   :  { %3160 = vmatprep.subr.msk.mxu0 %vm87_vm0, %v3564_v0 }
 0x639   :  { %s3427_s18 = spop %3426 }
 0x63a   :  { %753 = sst [smem:[#allocation4]] %s3427_s18 }
 0x6d9   :  { %v3109_v12 = vpop.f32.mrb[14].mxu0 }
 0x6da   :  { %v951_v13 = vadd.f32 %v3109_v12, %v3653_v30  ;;  %v945_v1 = vpop.f32.mrb[15].mxu0 }
 0x6db   :  { %v946_v14 = vadd.f32 %v3653_v30, %v945_v1 }
 0x6dd   :  { %v3337_v18 = vpack.c.bf16 %v951_v13, %v946_v14 }
 0x6de   :  { %v3112_v19 = vpop.f32.mrb[16].mxu0 }
 0x6df   :  { %v961_v20 = vadd.f32 %v3112_v19, %v3653_v30  ;;  %v955_v22 = vpop.f32.mrb[17].mxu0  ;;  %3338 = vmatpush3.bf16.msra.mxu1 %v3337_v18 }
 0x6e0   :  { %v956_v23 = vadd.f32 %v3653_v30, %v955_v22  ;;  %3339 = vmatprep.subr.bf16.mxu1 %v3492_v29 }
 0x6e2   :  { %v3340_v24 = vpack.c.bf16 %v961_v20, %v956_v23 }
 0x6e4   :  { %3341 = vmatpush3.bf16.msra.mxu1 %v3340_v24 }
 0x6e7   :  { %3122 = vmatmul.mubr.msk.f32.vlgmr.msra.gmra.mrb[12].mxu1 %vm198_vm4, %v3663_v41 }
 0x6e8   :  { %3126 = vmatprep.mubr.msk.f32.mxu1 %vm393_vm8, %v3670_v42 }
 0x7ba   :  { %v1030_v3 = vpop.f32.mrb[12].mxu1 }
 0x7bb   :  { %v1034_v27 = vsub.f32 %v1030_v3, %v3677_v43  ;;  %v3123_v28 = vpop.f32.mrb[13].mxu1 }
 0x7bd   :  { %v2782_v34 = vclamps-f32 %v1034_v27, 1.0  ;;  %v1035_v35 = vand.u32 2147483647, %v1034_v27  ;;  %v1037_v36 = vmul.f32 0.5, %v1034_v27 }
 0x7bf   :  { %v1056_v37 = vmul.f32 0.015625, %v2782_v34  ;;  %vm1036_vm6 = vcmp.lt.f32.partialorder %v1035_v35, 1.0  ;;  %v1038_v38 = vmul.f32 %v1037_v36, %v1034_v27  ;;  %v2781_v39 = vadd.f32 -0.5, %v1035_v35 }
 0x7c1   :  { %3124 = vmatprep.subr.msk.mxu1 %vm406_vm9, %v1056_v37  ;;  %v1040_v17 = vsel %vm1036_vm6, %v1038_v38, %v2781_v39 }
 0x7c2   :  { %3125 = vmatpush3.msk.msra.mxu1 %vm406_vm9, %v1056_v37  ;;  %v1041_v26 = vsel %vm376_vm10, %v1040_v17, 0.0 }
 0x7c3   :  { %3127 = vmatmul.mubr.msk.f32.vlgmr.msra.gmra.mrb[14].mxu1 %vm393_vm8, %v3683_v53  ;;  %1042 = vadd.xlane.f32.xlu1 %v1041_v26 }
 0x7c4   :  { %3129 = vmatprep.mubr.msk.f32.mxu1 %vm393_vm8, %v3689_v55  ;;  %3351 = vmatprep.subr.bf16.mxu1 %v3732_v8 }
 0x7c5   :  { %3353 = vmatpush3.bf16.msra.mxu1 %v3732_v8 }
 0x7c6   :  { %3355 = vmatprep.subr.bf16.mxu1 %v3749_v31 }
 0x7c7   :  { %3130 = vmatmul.mubr.msk.f32.gmra.mrb[16].mxu1 %vm393_vm8, %v3700_v57 }
 0x7c9   :  { %3357 = vmatpush3.bf16.msra.mxu1 %v3749_v31 }
 0x7ca   :  { %3359 = vmatprep.subr.bf16.mxu1 %v3604_v7 }
 0x850   :  { %v1043_v40 = vpop.xlane.xlu1 %1042 }
 0x851   :  { %v1044_v25 = vrot.slane %v1043_v40, 4 }
 0x853   :  { %v1045_v44 = vadd.f32 %v1044_v25, %v1043_v40 }
 0x855   :  { %v1046_v45 = vrot.slane %v1045_v44, 2 }
 0x857   :  { %v1047_v48 = vadd.f32 %v1046_v45, %v1045_v44 }
 0x859   :  { %v1048_v49 = vrot.slane %v1047_v48, 1 }
 0x85b   :  { %v1049_v50 = vadd.f32 %v1048_v49, %v1047_v48 }
 0x85d   :  { %3428 = vpush %v1049_v50 }
 0x88e   :  { %s3429_s19 = spop %3428 }
 0x88f   :  { %s1053_s20 = smul.f32 0.015625, %s3429_s19 }
 0x891   :  { %1402 = sst [smem:[#allocation2 + $0x1]] %s1053_s20  ;;  %s3467_s20 = scalar_lea.hbm %s4250_s11, 16 }
 0x892   :  { %p3468_p0 = scmp.ne.s32.totalorder %s4250_s11, %s3467_s20  ;;  %p3471_p1 = scmp.lt.u32.totalorder %s3467_s20, %s4250_s11 }
 0x894   :  { %p3473_p2 = pnand %p3471_p1, %p3468_p0 }
 0x896   :  { %v3128_v51 = vpop.f32.mrb[14].mxu1 }
 0x897   :  { %v1126_v52 = vpop.f32.mrb[15].mxu1 }
 0x898   :  { %3140 = vmatprep.mubr.msk.f32.mxu0 %vm198_vm4, %v1126_v52 }
 0x899   :  { %3141 = vmatmul.mubr.msk.f32.vlgmr.msra.gmra.mrb[18].mxu0 %vm198_vm4, %v3128_v51 }
 0x89a   :  { %v3131_v54 = vpop.f32.mrb[16].mxu1  ;;  %3161 = vmatpush3.msk.msra.mxu0 %vm87_vm0, %v3564_v0 }
 0x89b   :  { %v1136_v56 = vpop.f32.mrb[17].mxu1  ;;  %3366 = vmatprep.subr.bf16.mxu0 %v3492_v29 }
 0x89c   :  { %3143 = vmatprep.mubr.msk.f32.mxu0 %vm198_vm4, %v1136_v56 }
 0x89d   :  { %3144 = vmatmul.mubr.msk.f32.gmra.mrb[20].mxu0 %vm198_vm4, %v3131_v54 }
 0x96c   :  { %v3142_v58 = vpop.f32.mrb[18].mxu0 }
 0x96d   :  { %v1223_v59 = vpop.f32.mrb[19].mxu0  ;;  %v1243_v6 = vmul.f32 %v3142_v58, %v3834_v46 }
 0x96e   :  { %v1242_v62 = vmul.f32 %v3837_v47, %v1223_v59 }
 0x970   :  { %v3145_v2 = vpop.f32.mrb[20].mxu0  ;;  %3154 = vmatprep.mubr.msk.f32.mxu1 %vm198_vm4, %v1242_v62 }
 0x971   :  { %v1233_v9 = vpop.f32.mrb[21].mxu0  ;;  %3155 = vmatmul.mubr.msk.f32.vlgmr.msra.gmra.mrb[18].mxu1 %vm198_vm4, %v1243_v6  ;;  %v1245_v13 = vmul.f32 %v3145_v2, %v3845_v61 }
 0x972   :  { %v1244_v12 = vmul.f32 %v3849_v5, %v1233_v9  ;;  %3361 = vmatpush3.bf16.msra.mxu1 %v3604_v7 }
 0x973   :  { %3363 = vmatprep.subr.bf16.mxu1 %v3614_v10 }
 0x974   :  { %3157 = vmatprep.mubr.msk.f32.mxu1 %vm198_vm4, %v1244_v12 }
 0x975   :  { %3158 = vmatmul.mubr.msk.f32.gmra.mrb[20].mxu1 %vm198_vm4, %v1245_v13 }
 0x976   :  { %3365 = vmatpush3.bf16.msra.mxu1 %v3614_v10 }
 0x977   :  { %3373 = vmatprep.subr.bf16.mxu1 %v3710_v60 }
 0xa44   :  { %v3156_v46 = vpop.f32.mrb[18].mxu1 }
 0xa45   :  { %v1344_v47 = vsel %vm67_vm12, 0.0, %v3156_v46  ;;  %v1377_v1 = vmul.f32 0.1, %v3156_v46  ;;  %v1324_v5 = vpop.f32.mrb[19].mxu1 }
 0xa46   :  { %v1348_v14 = vmul.f32 %v1344_v47, %v1344_v47  ;;  %v1343_v61 = vsel %vm67_vm12, 0.0, %v1324_v5  ;;  %v1376_v18 = vmul.f32 0.1, %v1324_v5 }
 0xa47   :  { %v1381_v19 = vsub.f32 %v3784_v15, %v1377_v1  ;;  %v1347_v20 = vmul.f32 %v1343_v61, %v1343_v61 }
 0xa48   :  { %v1352_v22 = vsel %vm74_vm1, %v1348_v14, 0.0  ;;  %v1380_v23 = vsub.f32 %v3795_v4, %v1376_v18  ;;  %v3159_v24 = vpop.f32.mrb[20].mxu1 }
 0xa49   :  { %v1385_v3 = vmax.f32 %v1381_v19, 0.0  ;;  %v1351_v27 = vsel %vm74_vm1, %v1347_v20, 0.0  ;;  %v1346_v28 = vsel %vm67_vm12, 0.0, %v3159_v24  ;;  %v1379_v34 = vmul.f32 0.1, %v3159_v24  ;;  %v1334_v35 = vpop.f32.mrb[21].mxu1 }
 0xa4a   :  { %v1353_v36 = vadd.f32 %v1352_v22, %v1351_v27  ;;  %v1384_v37 = vmax.f32 %v1380_v23, 0.0  ;;  %v1350_v38 = vmul.f32 %v1346_v28, %v1346_v28  ;;  %v1345_v15 = vsel %vm67_vm12, 0.0, %v1334_v35 }
 0xa4b   :  { %v1389_v39 = vmin.f32 %v1385_v3, 1.0  ;;  %v1383_v17 = vsub.f32 %v3809_v32, %v1379_v34  ;;  %v1349_v26 = vmul.f32 %v1345_v15, %v1345_v15  ;;  %v1378_v4 = vmul.f32 0.1, %v1334_v35 }
 0xa4c   :  { %v1388_v40 = vmin.f32 %v1384_v37, 1.0 }
 0xa4d   :  { %v3918_v25 = vsel %vm67_vm12, %v1389_v39, %v1381_v19  ;;  %v1387_v44 = vmax.f32 %v1383_v17, 0.0  ;;  %v1354_v45 = vsel %vm74_vm1, %v1349_v26, 0.0  ;;  %v1382_v48 = vsub.f32 %v3818_v33, %v1378_v4 }
 0xa4e   :  { %2797 = vst.msk [vmem:[%s4249_s10 + $0x28] sm:$0xff] %vm74_vm1, %v3918_v25  ;;  %v3929_v32 = vsel %vm67_vm12, %v1388_v40, %v1380_v23  ;;  %v1355_v49 = vadd.f32 %v1354_v45, %v1353_v36  ;;  %v1356_v33 = vsel %vm74_vm1, %v1350_v38, 0.0 }
 0xa4f   :  { %v1391_v50 = vmin.f32 %v1387_v44, 1.0  ;;  %v1386_v51 = vmax.f32 %v1382_v48, 0.0  ;;  %2796 = vst.msk [vmem:[%s4249_s10 + $0x20] sm:$0xff] %vm74_vm1, %v3929_v32  ;;  %3162 = vmatprep.mubr.msk.f32.mxu0 %vm74_vm1, %v3929_v32 }
 0xa50   :  { %3163 = vmatmul.mubr.msk.f32.vlgmr.msra.gmra.mrb[22].mxu0 %vm74_vm1, %v3918_v25  ;;  %v1357_v52 = vadd.f32 %v1356_v33, %v1355_v49 }
 0xa51   :  { %v1390_v54 = vmin.f32 %v1386_v51, 1.0  ;;  %v3943_v56 = vsel %vm67_vm12, %v1391_v50, %v1383_v17 }
 0xa52   :  { %1358 = vadd.xlane.f32.xlu1 %v1357_v52  ;;  %2799 = vst.msk [vmem:[%s4249_s10 + $0x38] sm:$0xff] %vm74_vm1, %v3943_v56 }
 0xa53   :  { %v3952_v58 = vsel %vm67_vm12, %v1390_v54, %v1382_v48 }
 0xa54   :  { %2798 = vst.msk [vmem:[%s4249_s10 + $0x30] sm:$0xff] %vm74_vm1, %v3952_v58  ;;  %3165 = vmatprep.mubr.msk.f32.mxu0 %vm74_vm1, %v3952_v58 }
 0xa55   :  { %3166 = vmatmul.mubr.msk.f32.gmra.mrb[24].mxu0 %vm74_vm1, %v3943_v56 }
 0xa56   :  { %3190 = vmatprep.mubr.msk.f32.mxu0 %vm3493_vm7, %v3491_v16 }
 0xadf   :  { %v1359_v59 = vpop.xlane.xlu1 %1358 }
 0xae0   :  { %v1360_v62 = vrot.slane %v1359_v59, 4 }
 0xae2   :  { %v1361_v6 = vadd.f32 %v1360_v62, %v1359_v59 }
 0xae4   :  { %v1362_v2 = vrot.slane %v1361_v6, 2 }
 0xae6   :  { %v1363_v9 = vadd.f32 %v1362_v2, %v1361_v6 }
 0xae8   :  { %v1364_v12 = vrot.slane %v1363_v9, 1 }
 0xaea   :  { %v1365_v13 = vadd.f32 %v1364_v12, %v1363_v9 }
 0xaec   :  { %3430 = vpush %v1365_v13 }
 0xb1d   :  { %s3431_s2 = spop %3430 }
 0xb1e   :  { %v1367_v46 = vstv %s3431_s2 }
 0xb1f   :  { %3453 = vrsqrt.f32 %v1367_v46  ;;  %vm1370_vm15 = vcmp.eq.f32.partialorder %v1367_v46, inf  ;;  %v1373_v34 = vand.u32 2147483648, %v1367_v46  ;;  %vm1372_vm3 = vcmp.eq.f32.partialorder %v1367_v46, 0.0 }
 0xb23   :  { %v3164_v47 = vpop.f32.mrb[22].mxu0 }
 0xb24   :  { %v1489_v1 = vadd.f32 %v3164_v47, %v3621_v11  ;;  %v1483_v5 = vpop.f32.mrb[23].mxu0 }
 0xb25   :  { %v1484_v14 = vadd.f32 %v3621_v11, %v1483_v5 }
 0xb26   :  { %vm1503_vm11 = vcmp.gt.f32.partialorder %v1489_v1, 0.0 }
 0xb27   :  { %v3968_v61 = vsel %vm1503_vm11, 1.0, %v3491_v16  ;;  %vm1502_vm13 = vcmp.gt.f32.partialorder %v1484_v14, 0.0 }
 0xb28   :  { %v3971_v18 = vsel %vm1502_vm13, 1.0, %v3491_v16  ;;  %v3167_v19 = vpop.f32.mrb[24].mxu0  ;;  %v1515_v3 = vmul.f32 %v3968_v61, %v1489_v1 }
 0xb29   :  { %v3454_v20 = vpop.eup %3453  ;;  %v1514_v22 = vmul.f32 %v3971_v18, %v1484_v14  ;;  %v1499_v23 = vadd.f32 %v3167_v19, %v3621_v11  ;;  %v1493_v24 = vpop.f32.mrb[25].mxu0 }
 0xb2a   :  { %v1494_v27 = vadd.f32 %v3621_v11, %v1493_v24  ;;  %v1369_v28 = vmul.f32 %v3454_v20, %v1367_v46 }
 0xb2b   :  { %vm1505_vm14 = vcmp.gt.f32.partialorder %v1499_v23, 0.0  ;;  %3176 = vmatprep.mubr.msk.f32.mxu1 %vm198_vm4, %v1514_v22 }
 0xb2c   :  { %v3979_v35 = vsel %vm1505_vm14, 1.0, %v3491_v16  ;;  %vm1504_vm2 = vcmp.gt.f32.partialorder %v1494_v27, 0.0  ;;  %3177 = vmatmul.mubr.msk.f32.vlgmr.msra.gmra.mrb[22].mxu1 %vm198_vm4, %v1515_v3  ;;  %v1371_v36 = vsel %vm1370_vm15, %v1367_v46, %v1369_v28 }
 0xb2d   :  { %v3983_v37 = vsel %vm1504_vm2, 1.0, %v3491_v16  ;;  %v1374_v38 = vsel %vm1372_vm3, %v1373_v34, %v1371_v36  ;;  %3375 = vmatpush3.bf16.msra.mxu1 %v3710_v60  ;;  %v1517_v15 = vmul.f32 %v3979_v35, %v1499_v23 }
 0xb2e   :  { %v1516_v11 = vmul.f32 %v3983_v37, %v1494_v27  ;;  %3432 = vpush %v1374_v38  ;;  %3377 = vmatprep.subr.bf16.mxu1 %v3720_v63 }
 0xb30   :  { %3179 = vmatprep.mubr.msk.f32.mxu1 %vm198_vm4, %v1516_v11 }
 0xb31   :  { %3180 = vmatmul.mubr.msk.f32.gmra.mrb[24].mxu1 %vm198_vm4, %v1517_v15 }
 0xb32   :  { %3379 = vmatpush3.bf16.msra.mxu1 %v3720_v63 }
 0xb33   :  { %3229 = vmatprep.subr.msk.mxu1 %vm87_vm0, %v3564_v0 }
 0xb5f   :  { %s3433_s27 = spop %3432 }
 0xb60   :  { %1404 = sst [smem:[#allocation4 + $0x1]] %s3433_s27 }
 0xbff   :  { %v3178_v39 = vpop.f32.mrb[22].mxu1 }
 0xc00   :  { %v1602_v17 = vadd.f32 %v3178_v39, %v3653_v30  ;;  %v1596_v26 = vpop.f32.mrb[23].mxu1 }
 0xc01   :  { %v1597_v4 = vadd.f32 %v3653_v30, %v1596_v26 }
 0xc03   :  { %v3367_v40 = vpack.c.bf16 %v1602_v17, %v1597_v4 }
 0xc04   :  { %v3181_v44 = vpop.f32.mrb[24].mxu1 }
 0xc05   :  { %v1612_v45 = vadd.f32 %v3181_v44, %v3653_v30  ;;  %v1606_v48 = vpop.f32.mrb[25].mxu1  ;;  %3368 = vmatpush3.bf16.msra.mxu0 %v3367_v40 }
 0xc06   :  { %v1607_v49 = vadd.f32 %v3653_v30, %v1606_v48  ;;  %3369 = vmatprep.subr.bf16.mxu0 %v3492_v29 }
 0xc08   :  { %v3370_v50 = vpack.c.bf16 %v1612_v45, %v1607_v49 }
 0xc0a   :  { %3371 = vmatpush3.bf16.msra.mxu0 %v3370_v50 }
 0xc0d   :  { %3191 = vmatmul.mubr.msk.f32.vlgmr.msra.gmra.mrb[26].mxu0 %vm198_vm4, %v3663_v41 }
 0xc0e   :  { %3195 = vmatprep.mubr.msk.f32.mxu0 %vm393_vm8, %v3670_v42 }
 0xce0   :  { %v1681_v51 = vpop.f32.mrb[26].mxu0 }
 0xce1   :  { %v1685_v33 = vsub.f32 %v1681_v51, %v3677_v43  ;;  %v3192_v52 = vpop.f32.mrb[27].mxu0 }
 0xce3   :  { %v2815_v54 = vclamps-f32 %v1685_v33, 1.0  ;;  %v1686_v59 = vand.u32 2147483647, %v1685_v33  ;;  %v1688_v62 = vmul.f32 0.5, %v1685_v33 }
 0xce5   :  { %v1707_v6 = vmul.f32 0.015625, %v2815_v54  ;;  %vm1687_vm5 = vcmp.lt.f32.partialorder %v1686_v59, 1.0  ;;  %v1689_v30 = vmul.f32 %v1688_v62, %v1685_v33  ;;  %v2814_v2 = vadd.f32 -0.5, %v1686_v59 }
 0xce7   :  { %3193 = vmatprep.subr.msk.mxu0 %vm406_vm9, %v1707_v6  ;;  %v1691_v9 = vsel %vm1687_vm5, %v1689_v30, %v2814_v2 }
 0xce8   :  { %3194 = vmatpush3.msk.msra.mxu0 %vm406_vm9, %v1707_v6  ;;  %v1692_v41 = vsel %vm376_vm10, %v1691_v9, 0.0 }
 0xce9   :  { %3196 = vmatmul.mubr.msk.f32.vlgmr.msra.gmra.mrb[28].mxu0 %vm393_vm8, %v3683_v53  ;;  %1693 = vadd.xlane.f32.xlu0 %v1692_v41 }
 0xcea   :  { %3198 = vmatprep.mubr.msk.f32.mxu0 %vm393_vm8, %v3689_v55  ;;  %3381 = vmatprep.subr.bf16.mxu0 %v3732_v8 }
 0xceb   :  { %3383 = vmatpush3.bf16.msra.mxu0 %v3732_v8 }
 0xcec   :  { %3385 = vmatprep.subr.bf16.mxu0 %v3749_v31 }
 0xced   :  { %3199 = vmatmul.mubr.msk.f32.gmra.mrb[30].mxu0 %vm393_vm8, %v3700_v57 }
 0xcef   :  { %3387 = vmatpush3.bf16.msra.mxu0 %v3749_v31 }
 0xcf0   :  { %3389 = vmatprep.subr.bf16.mxu0 %v3604_v7 }
 0xd76   :  { %v1694_v42 = vpop.xlane.xlu0 %1693 }
 0xd77   :  { %v1695_v43 = vrot.slane %v1694_v42, 4 }
 0xd79   :  { %v1696_v53 = vadd.f32 %v1695_v43, %v1694_v42 }
 0xd7b   :  { %v1697_v12 = vrot.slane %v1696_v53, 2 }
 0xd7d   :  { %v1698_v13 = vadd.f32 %v1697_v12, %v1696_v53 }
 0xd7f   :  { %v1699_v46 = vrot.slane %v1698_v13, 1 }
 0xd81   :  { %v1700_v55 = vadd.f32 %v1699_v46, %v1698_v13 }
 0xd83   :  { %3434 = vpush %v1700_v55 }
 0xdb4   :  { %s3435_s28 = spop %3434 }
 0xdb5   :  { %s1704_s3 = smul.f32 0.015625, %s3435_s28 }
 0xdb7   :  { %2053 = sst [smem:[#allocation2 + $0x2]] %s1704_s3 }
 0xdbc   :  { %v3197_v47 = vpop.f32.mrb[28].mxu0 }
 0xdbd   :  { %v1777_v1 = vpop.f32.mrb[29].mxu0 }
 0xdbe   :  { %3209 = vmatprep.mubr.msk.f32.mxu1 %vm198_vm4, %v1777_v1 }
 0xdbf   :  { %3210 = vmatmul.mubr.msk.f32.vlgmr.msra.gmra.mrb[26].mxu1 %vm198_vm4, %v3197_v47 }
 0xdc0   :  { %v3200_v57 = vpop.f32.mrb[30].mxu0  ;;  %3230 = vmatpush3.msk.msra.mxu1 %vm87_vm0, %v3564_v0 }
 0xdc1   :  { %v1787_v5 = vpop.f32.mrb[31].mxu0  ;;  %3396 = vmatprep.subr.bf16.mxu1 %v3492_v29 }
 0xdc2   :  { %3212 = vmatprep.mubr.msk.f32.mxu1 %vm198_vm4, %v1787_v5  ;;  %v3459_v5 = vld [vmem:[%s4243_s4] ss:$0 sm:$0xff] }
 0xdc3   :  { %3213 = vmatmul.mubr.msk.f32.gmra.mrb[28].mxu1 %vm198_vm4, %v3200_v57 }
 0xe92   :  { %v3211_v14 = vpop.f32.mrb[26].mxu1 }
 0xe93   :  { %v1874_v19 = vpop.f32.mrb[27].mxu1  ;;  %v1894_v22 = vmul.f32 %v3211_v14, %v3968_v61 }
 0xe94   :  { %v1893_v20 = vmul.f32 %v3971_v18, %v1874_v19 }
 0xe96   :  { %v3214_v23 = vpop.f32.mrb[28].mxu1  ;;  %3223 = vmatprep.mubr.msk.f32.mxu0 %vm198_vm4, %v1893_v20 }
 0xe97   :  { %v1884_v24 = vpop.f32.mrb[29].mxu1  ;;  %3224 = vmatmul.mubr.msk.f32.vlgmr.msra.gmra.mrb[32].mxu0 %vm198_vm4, %v1894_v22  ;;  %v1896_v3 = vmul.f32 %v3214_v23, %v3979_v35 }
 0xe98   :  { %v1895_v0 = vmul.f32 %v3983_v37, %v1884_v24  ;;  %3391 = vmatpush3.bf16.msra.mxu0 %v3604_v7 }
 0xe99   :  { %3393 = vmatprep.subr.bf16.mxu0 %v3614_v10 }
 0xe9a   :  { %3226 = vmatprep.mubr.msk.f32.mxu0 %vm198_vm4, %v1895_v0 }
 0xe9b   :  { %3227 = vmatmul.mubr.msk.f32.gmra.mrb[34].mxu0 %vm198_vm4, %v1896_v3 }
 0xe9c   :  { %3395 = vmatpush3.bf16.msra.mxu0 %v3614_v10 }
 0xe9d   :  { %3403 = vmatprep.subr.bf16.mxu0 %v3710_v60 }
 0xf6a   :  { %v3225_v61 = vpop.f32.mrb[32].mxu0 }
 0xf6b   :  { %v1995_v18 = vsel %vm67_vm12, 0.0, %v3225_v61  ;;  %v2028_v27 = vmul.f32 0.1, %v3225_v61  ;;  %v1975_v28 = vpop.f32.mrb[33].mxu0 }
 0xf6c   :  { %v1999_v34 = vmul.f32 %v1995_v18, %v1995_v18  ;;  %v1994_v7 = vsel %vm67_vm12, 0.0, %v1975_v28  ;;  %v2027_v35 = vmul.f32 0.1, %v1975_v28 }
 0xf6d   :  { %v2032_v36 = vsub.f32 %v3918_v25, %v2028_v27  ;;  %v1998_v37 = vmul.f32 %v1994_v7, %v1994_v7 }
 0xf6e   :  { %v2003_v38 = vsel %vm74_vm1, %v1999_v34, 0.0  ;;  %v2031_v10 = vsub.f32 %v3929_v32, %v2027_v35  ;;  %v3228_v11 = vpop.f32.mrb[34].mxu0 }
 0xf6f   :  { %v2036_v15 = vmax.f32 %v2032_v36, 0.0  ;;  %v2002_v39 = vsel %vm74_vm1, %v1998_v37, 0.0  ;;  %v1997_v17 = vsel %vm67_vm12, 0.0, %v3228_v11  ;;  %v2030_v26 = vmul.f32 0.1, %v3228_v11  ;;  %v1985_v4 = vpop.f32.mrb[35].mxu0 }
 0xf70   :  { %v2004_v40 = vadd.f32 %v2003_v38, %v2002_v39  ;;  %v2035_v44 = vmax.f32 %v2031_v10, 0.0  ;;  %v2001_v45 = vmul.f32 %v1997_v17, %v1997_v17  ;;  %v1996_v25 = vsel %vm67_vm12, 0.0, %v1985_v4 }
 0xf71   :  { %v2040_v48 = vmin.f32 %v2036_v15, 1.0  ;;  %v2034_v49 = vsub.f32 %v3943_v56, %v2030_v26  ;;  %v2000_v50 = vmul.f32 %v1996_v25, %v1996_v25  ;;  %v2029_v32 = vmul.f32 0.1, %v1985_v4  ;;  %v3461_v25 = vld [vmem:[%s4247_s8] sm:$0x3] }
 0xf72   :  { %v2039_v51 = vmin.f32 %v2035_v44, 1.0 }
 0xf73   :  { %v4052_v33 = vsel %vm67_vm12, %v2040_v48, %v2032_v36  ;;  %v2038_v52 = vmax.f32 %v2034_v49, 0.0  ;;  %v2005_v54 = vsel %vm74_vm1, %v2000_v50, 0.0  ;;  %v2033_v59 = vsub.f32 %v3952_v58, %v2029_v32  ;;  %v3462_v48 = vld [vmem:[%s4248_s9] sm:$0xff] }
 0xf74   :  { %2830 = vst.msk [vmem:[%s4249_s10 + $0x48] sm:$0xff] %vm74_vm1, %v4052_v33  ;;  %v4063_v56 = vsel %vm67_vm12, %v2039_v51, %v2031_v10  ;;  %v2006_v62 = vadd.f32 %v2005_v54, %v2004_v40  ;;  %v2007_v58 = vsel %vm74_vm1, %v2001_v45, 0.0  ;;  %v3463_v50 = vld [vmem:[%s4239_s0] sm:$0x3] }
 0xf75   :  { %v2042_v6 = vmin.f32 %v2038_v52, 1.0  ;;  %v2037_v30 = vmax.f32 %v2033_v59, 0.0  ;;  %2829 = vst.msk [vmem:[%s4249_s10 + $0x40] sm:$0xff] %vm74_vm1, %v4063_v56  ;;  %3231 = vmatprep.mubr.msk.f32.mxu1 %vm74_vm1, %v4063_v56 }
 0xf76   :  { %3232 = vmatmul.mubr.msk.f32.vlgmr.msra.gmra.mrb[30].mxu1 %vm74_vm1, %v4052_v33  ;;  %v2008_v2 = vadd.f32 %v2007_v58, %v2006_v62 }
 0xf77   :  { %v2041_v9 = vmin.f32 %v2037_v30, 1.0  ;;  %v4077_v41 = vsel %vm67_vm12, %v2042_v6, %v2034_v49 }
 0xf78   :  { %2009 = vadd.xlane.f32.xlu1 %v2008_v2  ;;  %2832 = vst.msk [vmem:[%s4249_s10 + $0x58] sm:$0xff] %vm74_vm1, %v4077_v41  ;;  %v3464_v2 = vld [vmem:[%s4248_s9 + $0x8] sm:$0xff] }
 0xf79   :  { %v4086_v42 = vsel %vm67_vm12, %v2041_v9, %v2033_v59  ;;  %v3465_v9 = vld [vmem:[%s4248_s9 + $0x10] sm:$0xff] }
 0xf7a   :  { %2831 = vst.msk [vmem:[%s4249_s10 + $0x50] sm:$0xff] %vm74_vm1, %v4086_v42  ;;  %3234 = vmatprep.mubr.msk.f32.mxu1 %vm74_vm1, %v4086_v42 }
 0xf7b   :  { %3235 = vmatmul.mubr.msk.f32.gmra.mrb[32].mxu1 %vm74_vm1, %v4077_v41 }
 0xf7c   :  { %3259 = vmatprep.mubr.msk.f32.mxu1 %vm3493_vm7, %v3491_v16 }
0x1005   :  { %v2010_v43 = vpop.xlane.xlu1 %2009 }
0x1006   :  { %v2011_v53 = vrot.slane %v2010_v43, 4 }
0x1008   :  { %v2012_v12 = vadd.f32 %v2011_v53, %v2010_v43  ;;  %v3466_v43 = vld [vmem:[%s4248_s9 + $0x18] sm:$0xff] }
0x100a   :  { %v2013_v13 = vrot.slane %v2012_v12, 2 }
0x100c   :  { %v2014_v46 = vadd.f32 %v2013_v13, %v2012_v12 }
0x100e   :  { %v2015_v55 = vrot.slane %v2014_v46, 1 }
0x1010   :  { %v2016_v47 = vadd.f32 %v2015_v55, %v2014_v46 }
0x1012   :  { %3436 = vpush %v2016_v47 }
0x1043   :  { %s3437_s18 = spop %3436 }
0x1044   :  { %v2018_v1 = vstv %s3437_s18 }
0x1045   :  { %3455 = vrsqrt.f32 %v2018_v1  ;;  %vm2021_vm11 = vcmp.eq.f32.partialorder %v2018_v1, inf  ;;  %v2024_v7 = vand.u32 2147483648, %v2018_v1  ;;  %vm2023_vm14 = vcmp.eq.f32.partialorder %v2018_v1, 0.0 }
0x1049   :  { %v3233_v57 = vpop.f32.mrb[30].mxu1 }
0x104a   :  { %v2140_v14 = vadd.f32 %v3459_v5, %v3233_v57  ;;  %v2134_v19 = vpop.f32.mrb[31].mxu1 }
0x104b   :  { %v2135_v20 = vadd.f32 %v3459_v5, %v2134_v19 }
0x104c   :  { %vm2154_vm0 = vcmp.gt.f32.partialorder %v2140_v14, 0.0 }
0x104d   :  { %v4103_v22 = vsel %vm2154_vm0, 1.0, %v3491_v16  ;;  %vm2153_vm7 = vcmp.gt.f32.partialorder %v2135_v20, 0.0 }
0x104e   :  { %v4106_v23 = vsel %vm2153_vm7, 1.0, %v3491_v16  ;;  %v3236_v24 = vpop.f32.mrb[32].mxu1  ;;  %v2166_v27 = vmul.f32 %v4103_v22, %v2140_v14 }
0x104f   :  { %v3456_v0 = vpop.eup %3455  ;;  %v2165_v3 = vmul.f32 %v4106_v23, %v2135_v20  ;;  %v2150_v61 = vadd.f32 %v3459_v5, %v3236_v24  ;;  %v2144_v18 = vpop.f32.mrb[33].mxu1 }
0x1050   :  { %v2145_v28 = vadd.f32 %v3459_v5, %v2144_v18  ;;  %v2020_v34 = vmul.f32 %v3456_v0, %v2018_v1 }
0x1051   :  { %vm2156_vm6 = vcmp.gt.f32.partialorder %v2150_v61, 0.0  ;;  %3245 = vmatprep.mubr.msk.f32.mxu0 %vm198_vm4, %v2165_v3 }
0x1052   :  { %v4112_v35 = vsel %vm2156_vm6, 1.0, %v3491_v16  ;;  %vm2155_vm13 = vcmp.gt.f32.partialorder %v2145_v28, 0.0  ;;  %3246 = vmatmul.mubr.msk.f32.vlgmr.msra.gmra.mrb[36].mxu0 %vm198_vm4, %v2166_v27  ;;  %v2022_v36 = vsel %vm2021_vm11, %v2018_v1, %v2020_v34 }
0x1053   :  { %v4116_v37 = vsel %vm2155_vm13, 1.0, %v3491_v16  ;;  %v2025_v38 = vsel %vm2023_vm14, %v2024_v7, %v2022_v36  ;;  %3405 = vmatpush3.bf16.msra.mxu0 %v3710_v60  ;;  %v2168_v11 = vmul.f32 %v4112_v35, %v2150_v61  ;;  %v3460_v60 = vld [vmem:[%s4246_s7] ss:$0 sm:$0xff] }
0x1054   :  { %v2167_v10 = vmul.f32 %v4116_v37, %v2145_v28  ;;  %3438 = vpush %v2025_v38  ;;  %3407 = vmatprep.subr.bf16.mxu0 %v3720_v63 }
0x1056   :  { %3248 = vmatprep.mubr.msk.f32.mxu0 %vm198_vm4, %v2167_v10 }
0x1057   :  { %3249 = vmatmul.mubr.msk.f32.gmra.mrb[38].mxu0 %vm198_vm4, %v2168_v11 }
0x1058   :  { %3409 = vmatpush3.bf16.msra.mxu0 %v3720_v63 }
0x1059   :  { %3411 = vmatprep.subr.bf16.mxu0 %v3732_v8 }
0x1085   :  { %s3439_s4 = spop %3438 }
0x1086   :  { %2055 = sst [smem:[#allocation4 + $0x2]] %s3439_s4 }
0x1125   :  { %v3247_v16 = vpop.f32.mrb[36].mxu0 }
0x1126   :  { %v2253_v15 = vadd.f32 %v3460_v60, %v3247_v16  ;;  %v2247_v39 = vpop.f32.mrb[37].mxu0 }
0x1127   :  { %v2248_v17 = vadd.f32 %v3460_v60, %v2247_v39 }
0x1129   :  { %v3397_v26 = vpack.c.bf16 %v2253_v15, %v2248_v17 }
0x112a   :  { %v3250_v4 = vpop.f32.mrb[38].mxu0 }
0x112b   :  { %v2263_v40 = vadd.f32 %v3460_v60, %v3250_v4  ;;  %v2257_v44 = vpop.f32.mrb[39].mxu0  ;;  %3398 = vmatpush3.bf16.msra.mxu1 %v3397_v26 }
0x112c   :  { %v2258_v45 = vadd.f32 %v3460_v60, %v2257_v44  ;;  %3399 = vmatprep.subr.bf16.mxu1 %v3492_v29 }
0x112e   :  { %v3400_v63 = vpack.c.bf16 %v2263_v40, %v2258_v45 }
0x1130   :  { %3401 = vmatpush3.bf16.msra.mxu1 %v3400_v63 }
0x1133   :  { %3260 = vmatmul.mubr.msk.f32.vlgmr.msra.gmra.mrb[34].mxu1 %vm198_vm4, %v3461_v25 }
0x1134   :  { %3264 = vmatprep.mubr.msk.f32.mxu1 %vm393_vm8, %v3462_v48 }
0x1206   :  { %v2332_v49 = vpop.f32.mrb[34].mxu1 }
0x1207   :  { %v2336_v29 = vsub.f32 %v2332_v49, %v3463_v50  ;;  %v3261_v32 = vpop.f32.mrb[35].mxu1 }
0x1209   :  { %v2848_v51 = vclamps-f32 %v2336_v29, 1.0  ;;  %v2337_v52 = vand.u32 2147483647, %v2336_v29  ;;  %v2339_v54 = vmul.f32 0.5, %v2336_v29 }
0x120b   :  { %v2358_v59 = vmul.f32 0.015625, %v2848_v51  ;;  %vm2338_vm15 = vcmp.lt.f32.partialorder %v2337_v52, 1.0  ;;  %v2340_v62 = vmul.f32 %v2339_v54, %v2336_v29  ;;  %v2847_v6 = vadd.f32 -0.5, %v2337_v52 }
0x120d   :  { %3262 = vmatprep.subr.msk.mxu1 %vm406_vm9, %v2358_v59  ;;  %v2342_v30 = vsel %vm2338_vm15, %v2340_v62, %v2847_v6 }
0x120e   :  { %3263 = vmatpush3.msk.msra.mxu1 %vm406_vm9, %v2358_v59  ;;  %v2343_v58 = vsel %vm376_vm10, %v2342_v30, 0.0 }
0x120f   :  { %3265 = vmatmul.mubr.msk.f32.vlgmr.msra.gmra.mrb[36].mxu1 %vm393_vm8, %v3464_v2  ;;  %2344 = vadd.xlane.f32.xlu0 %v2343_v58 }
0x1210   :  { %3267 = vmatprep.mubr.msk.f32.mxu1 %vm393_vm8, %v3465_v9  ;;  %3418 = vmatprep.subr.bf16.mxu1 %v3732_v8 }
0x1211   :  { %3420 = vmatpush3.bf16.msra.mxu1 %v3732_v8 }
0x1212   :  { %3419 = vmatprep.subr.bf16.mxu1 %v3749_v31 }
0x1213   :  { %3268 = vmatmul.mubr.msk.f32.gmra.mrb[38].mxu1 %vm393_vm8, %v3466_v43 }
0x1215   :  { %3421 = vmatpush3.bf16.msra.mxu1 %v3749_v31 }
0x129c   :  { %v2345_v53 = vpop.xlane.xlu0 %2344 }
0x129d   :  { %v2346_v12 = vrot.slane %v2345_v53, 4 }
0x129f   :  { %v2347_v13 = vadd.f32 %v2346_v12, %v2345_v53 }
0x12a1   :  { %v2348_v46 = vrot.slane %v2347_v13, 2 }
0x12a3   :  { %v2349_v55 = vadd.f32 %v2348_v46, %v2347_v13 }
0x12a5   :  { %v2350_v47 = vrot.slane %v2349_v55, 1 }
0x12a7   :  { %v2351_v1 = vadd.f32 %v2350_v47, %v2349_v55 }
0x12a9   :  { %3440 = vpush %v2351_v1 }
0x12da   :  { %s3441_s3 = spop %3440 }
0x12db   :  { %s2355_s29 = smul.f32 0.015625, %s3441_s3 }
0x12dd   :  { %2704 = sst [smem:[#allocation2 + $0x3]] %s2355_s29 }
0x12e2   :  { %v3266_v57 = vpop.f32.mrb[36].mxu1 }
0x12e3   :  { %v2428_v5 = vpop.f32.mrb[37].mxu1 }
0x12e4   :  { %3278 = vmatprep.mubr.msk.f32.mxu0 %vm198_vm4, %v2428_v5 }
0x12e5   :  { %3279 = vmatmul.mubr.msk.f32.vlgmr.msra.gmra.mrb[40].mxu0 %vm198_vm4, %v3266_v57 }
0x12e6   :  { %v3269_v14 = vpop.f32.mrb[38].mxu1  ;;  %3413 = vmatpush3.bf16.msra.mxu0 %v3732_v8 }
0x12e7   :  { %v2438_v19 = vpop.f32.mrb[39].mxu1  ;;  %3415 = vmatprep.subr.bf16.mxu0 %v3749_v31 }
0x12e8   :  { %3281 = vmatprep.mubr.msk.f32.mxu0 %vm198_vm4, %v2438_v19 }
0x12e9   :  { %3282 = vmatmul.mubr.msk.f32.gmra.mrb[42].mxu0 %vm198_vm4, %v3269_v14 }
0x12ea   :  { %3417 = vmatpush3.bf16.msra.mxu0 %v3749_v31 }
0x13b8   :  { %v3280_v20 = vpop.f32.mrb[40].mxu0 }
0x13b9   :  { %v2525_v24 = vpop.f32.mrb[41].mxu0  ;;  %v2545_v3 = vmul.f32 %v3280_v20, %v4103_v22 }
0x13ba   :  { %v2544_v0 = vmul.f32 %v4106_v23, %v2525_v24 }
0x13bc   :  { %v3283_v61 = vpop.f32.mrb[42].mxu0  ;;  %3292 = vmatprep.mubr.msk.f32.mxu0 %vm198_vm4, %v2544_v0 }
0x13bd   :  { %v2535_v18 = vpop.f32.mrb[43].mxu0  ;;  %3293 = vmatmul.mubr.msk.f32.vlgmr.msra.gmra.mrb[44].mxu0 %vm198_vm4, %v2545_v3  ;;  %v2547_v27 = vmul.f32 %v3283_v61, %v4112_v35 }
0x13be   :  { %v2546_v8 = vmul.f32 %v4116_v37, %v2535_v18 }
0x13c0   :  { %3295 = vmatprep.mubr.msk.f32.mxu1 %vm198_vm4, %v2546_v8 }
0x13c1   :  { %3296 = vmatmul.mubr.msk.f32.vlgmr.msra.gmra.mrb[40].mxu1 %vm198_vm4, %v2547_v27 }
0x1490   :  { %v3294_v31 = vpop.f32.mrb[44].mxu0 }
0x1491   :  { %v2646_v23 = vsel %vm67_vm12, 0.0, %v3294_v31  ;;  %v2679_v28 = vmul.f32 0.1, %v3294_v31  ;;  %v2626_v22 = vpop.f32.mrb[45].mxu0 }
0x1492   :  { %v2650_v34 = vmul.f32 %v2646_v23, %v2646_v23  ;;  %v2645_v7 = vsel %vm67_vm12, 0.0, %v2626_v22  ;;  %v2678_v36 = vmul.f32 0.1, %v2626_v22 }
0x1493   :  { %v2683_v38 = vsub.f32 %v4052_v33, %v2679_v28  ;;  %v2649_v37 = vmul.f32 %v2645_v7, %v2645_v7 }
0x1494   :  { %v2654_v35 = vsel %vm74_vm1, %v2650_v34, 0.0  ;;  %v2682_v10 = vsub.f32 %v4063_v56, %v2678_v36  ;;  %v3297_v11 = vpop.f32.mrb[40].mxu1 }
0x1495   :  { %v2687_v16 = vmax.f32 %v2683_v38, 0.0  ;;  %v2653_v60 = vsel %vm74_vm1, %v2649_v37, 0.0  ;;  %v2648_v15 = vsel %vm67_vm12, 0.0, %v3297_v11  ;;  %v2681_v39 = vmul.f32 0.1, %v3297_v11  ;;  %v2636_v17 = vpop.f32.mrb[41].mxu1 }
0x1496   :  { %v2655_v26 = vadd.f32 %v2654_v35, %v2653_v60  ;;  %v2686_v4 = vmax.f32 %v2682_v10, 0.0  ;;  %v2652_v40 = vmul.f32 %v2648_v15, %v2648_v15  ;;  %v2647_v33 = vsel %vm67_vm12, 0.0, %v2636_v17 }
0x1497   :  { %v2691_v44 = vmin.f32 %v2687_v16, 1.0  ;;  %v2685_v45 = vsub.f32 %v4077_v41, %v2681_v39  ;;  %v2651_v63 = vmul.f32 %v2647_v33, %v2647_v33  ;;  %v2680_v56 = vmul.f32 0.1, %v2636_v17 }
0x1498   :  { %v2690_v25 = vmin.f32 %v2686_v4, 1.0  ;;  %v2658_v54 = vsel %vm74_vm1, %v2652_v40, 0.0 }
0x1499   :  { %v2695_v48 = vsel %vm67_vm12, %v2691_v44, %v2683_v38  ;;  %v2689_v49 = vmax.f32 %v2685_v45, 0.0  ;;  %v2656_v50 = vsel %vm74_vm1, %v2651_v63, 0.0  ;;  %v2684_v29 = vsub.f32 %v4086_v42, %v2680_v56 }
0x149a   :  { %2863 = vst.msk [vmem:[%s4249_s10 + $0x68] sm:$0xff] %vm74_vm1, %v2695_v48  ;;  %v2694_v32 = vsel %vm67_vm12, %v2690_v25, %v2682_v10  ;;  %v2657_v41 = vadd.f32 %v2656_v50, %v2655_v26 }
0x149b   :  { %2862 = vst.msk [vmem:[%s4249_s10 + $0x60] sm:$0xff] %vm74_vm1, %v2694_v32  ;;  %v2693_v51 = vmin.f32 %v2689_v49, 1.0  ;;  %v2688_v52 = vmax.f32 %v2684_v29, 0.0 }
0x149c   :  { %v2659_v59 = vadd.f32 %v2658_v54, %v2657_v41 }
0x149d   :  { %v2697_v42 = vsel %vm67_vm12, %v2693_v51, %v2685_v45  ;;  %v2692_v62 = vmin.f32 %v2688_v52, 1.0 }
0x149e   :  { %2865 = vst.msk [vmem:[%s4249_s10 + $0x78] sm:$0xff] %vm74_vm1, %v2697_v42  ;;  %2660 = vadd.xlane.f32.xlu1 %v2659_v59 }
0x149f   :  { %v2696_v6 = vsel %vm67_vm12, %v2692_v62, %v2684_v29 }
0x14a0   :  { %2864 = vst.msk [vmem:[%s4249_s10 + $0x70] sm:$0xff] %vm74_vm1, %v2696_v6 }
0x152b   :  { %v2661_v30 = vpop.xlane.xlu1 %2660 }
0x152c   :  { %v2662_v58 = vrot.slane %v2661_v30, 4 }
0x152d   :  { %3476 = shalt.err (!%p3473_p2)
}
0x152e   :  { %s3494_s23 = smov [#allocation2]   ;;  %v2663_v21 = vadd.f32 %v2662_v58, %v2661_v30  ;;  %s3477_s8 = scalar_lea.hbm %s4251_s12, 16 }
0x152f   :  { %2716 = dma.smem_to_hbm %s3494_s23, 16, %s4250_s11, [#allocation3]  }
0x1530   :  { %v2664_v2 = vrot.slane %v2663_v21, 2  ;;  %p3478_p3 = scmp.ne.s32.totalorder %s4251_s12, %s3477_s8  ;;  %p3481_p4 = scmp.lt.u32.totalorder %s3477_s8, %s4251_s12 }
0x1532   :  { %v2665_v9 = vadd.f32 %v2664_v2, %v2663_v21  ;;  %p3483_p5 = pnand %p3481_p4, %p3478_p3 }
0x1534   :  { %v2666_v43 = vrot.slane %v2665_v9, 1 }
0x1536   :  { %v2667_v53 = vadd.f32 %v2666_v43, %v2665_v9 }
0x1538   :  { %3442 = vpush %v2667_v53 }
0x1569   :  { %s3443_s10 = spop %3442 }
0x156a   :  { %v2669_v12 = vstv %s3443_s10 }
0x156b   :  { %3457 = vrsqrt.f32 %v2669_v12  ;;  %vm2672_vm1 = vcmp.eq.f32.partialorder %v2669_v12, inf  ;;  %v2675_v55 = vand.u32 2147483648, %v2669_v12  ;;  %vm2674_vm4 = vcmp.eq.f32.partialorder %v2669_v12, 0.0 }
0x1575   :  { %v3458_v13 = vpop.eup %3457 }
0x1576   :  { %v2671_v46 = vmul.f32 %v3458_v13, %v2669_v12 }
0x1578   :  { %v2673_v47 = vsel %vm2672_vm1, %v2669_v12, %v2671_v46 }
0x1579   :  { %v2676_v1 = vsel %vm2674_vm4, %v2675_v55, %v2673_v47 }
0x157a   :  { %3444 = vpush %v2676_v1 }
0x15ab   :  { %s3445_s6 = spop %3444 }
0x15ac   :  { %2706 = sst [smem:[#allocation4 + $0x3]] %s3445_s6 }
0x15ad   :  { %3486 = shalt.err (!%p3483_p5)
}
0x15ae   :  { %s3495_s28 = smov [#allocation4]  }
0x15af   :  { %2724 = dma.smem_to_hbm %s3495_s28, 16, %s4251_s12, [#allocation5]  }
0x15b0   :  { %3487 = dma.done.wait [#allocation3], 16  }
0x15b1   :  { %3488 = vsyncadd [#allocation3], 4294967280 }
0x15b2   :  { %3489 = dma.done.wait [#allocation5], 16  }
0x15b3   :  { %3490 = vsyncadd [#allocation5], 4294967280 }
0x15b4   :  { %2733 = sfence }
0x15b5   :  { %2734 = vsyncpa [#allocation3], 1 }
0x15b6   :  { %2735 = vsyncpa [#allocation5], 1 }

</bundles_post_ra>
